<compile_context>
chip_gen: v7x
topology: tpu7x:2x2x1
jax: 0.10.0
libtpu: 0.0.40
codegen_flags: <defaults>
</compile_context>

<pallas_src>
import jax
import jax.numpy as jnp
from jax import lax
from jax.experimental import pallas as pl
from jax.experimental.pallas import tpu as pltpu

# ---- config (mirrors config.char_dim / config.glove_dim) ---------------------
DCHAR = 32        # config.char_dim
DWORD = 96        # config.glove_dim  (DCHAR + DWORD = 128 -> lane-dense highway)
K = 5             # depthwise kernel size
PAD = K // 2
N_HIGHWAY = 2     # Highway(2, Dword + Dchar)


# ---------------------------------------------------------------------------
# Fused kernel: depthwise 5x5 conv -> pointwise 1x1 -> ReLU -> max over chars
#               -> [char | word] concat -> 2-layer Highway.   One batch / step.
# ---------------------------------------------------------------------------
def _embedding_kernel(ch_ref, wd_ref, taps_ref, dwb_ref, pw_ref, pwb_ref,
                      hw_w_ref, hw_b_ref, o_ref):
    """Refs (one grid step == one batch element):
       ch_ref  : (1, L+2P, (W+2P)*Dc) f32  zero-padded char emb, (W, Dc) on lanes
       wd_ref  : (1, L, Dw)           f32  word embeddings
       taps_ref: (K*K, W*Dc)          f32  depthwise taps, per-channel value tiled over W
       dwb_ref : (1, W*Dc)            f32  depthwise bias tiled over W
       pw_ref  : (W*Dc, W*Dc)         f32  pointwise conv as block-diag channel matmul
       pwb_ref : (1, W*Dc)            f32  pointwise bias tiled over W
       hw_w_ref: (2, D, 2D)           bf16 fused highway weights [Wg | Wl], (in, out)
       hw_b_ref: (2, 1, 2D)           f32  fused highway biases  [bg | bl]
       o_ref   : (1, L, D)            f32  lane-dense output slab (D = 128)
    """
    L, D = o_ref.shape[1], o_ref.shape[2]
    Dw = wd_ref.shape[2]
    Dc = D - Dw
    WDc = taps_ref.shape[1]
    W = WDc // Dc

    # ---- depthwise 5x5 conv: 25-tap FMA loop on lane-dense (L, W*Dc) vregs ----
    xs = ch_ref[0]                                   # (L+2P, (W+2P)*Dc)
    taps = taps_ref[...]
    acc = jnp.zeros((L, WDc), jnp.float32) + dwb_ref[...]
    for dy in range(K):                              # static 5x5 tap unroll
        rows = xs[dy:dy + L, :]                      # L-window  (sublane slice)
        for dx in range(K):
            win = rows[:, dx * Dc:dx * Dc + WDc]     # W-window  (lane slice)
            acc = acc + win * taps[dy * K + dx:dy * K + dx + 1, :]

    # ---- pointwise 1x1 conv == block-diagonal channel matmul (MXU), bias, ReLU
    y = jnp.dot(acc, pw_ref[...], preferred_element_type=jnp.float32) + pwb_ref[...]
    y = jnp.maximum(y, 0.0)

    # ---- max over the char axis W (static lane-slice reduction) --------------
    ch_feat = y[:, 0:Dc]
    for w in range(1, W):
        ch_feat = jnp.maximum(ch_feat, y[:, w * Dc:(w + 1) * Dc])   # (L, Dc)

    # ---- [char | word] -> lane-dense (L, 128) highway input ------------------
    x = jnp.concatenate([ch_feat, wd_ref[0]], axis=-1)              # (L, D)

    # ---- 2-layer Highway: one fused (D, 2D) bf16 MXU dot per layer -----------
    for i in range(N_HIGHWAY):                       # static unroll
        pre = jnp.dot(x.astype(jnp.bfloat16), hw_w_ref[i],
                      preferred_element_type=jnp.float32) + hw_b_ref[i]
        gate = pl.reciprocal(1.0 + jnp.exp(-pre[:, :D]), approx=True)   # sigmoid (EUP)
        nonlinear = jnp.maximum(pre[:, D:], 0.0)                        # ReLU
        x = x + gate * (nonlinear - x)               # == g*nl + (1-g)*x

    o_ref[0] = x


# ---------------------------------------------------------------------------
# One-time parameter re-layout (kept OUT of the jitted hot path)
# ---------------------------------------------------------------------------
def prepare_params(params, char_limit):
    """Re-layout PyTorch-format params for the kernel. Call once at load time."""
    W = char_limit
    Dc = params["dw_b"].shape[0]
    D = params["gate_w0"].shape[0]

    # depthwise weight (Dc, 1, K, K) -> tap table (K*K, Dc), tiled over W
    taps = jnp.transpose(params["dw_w"][:, 0, :, :], (1, 2, 0)).reshape(K * K, Dc)
    taps = jnp.tile(taps, (1, W))                                   # (K*K, W*Dc)
    dwb = jnp.tile(params["dw_b"], W).reshape(1, W * Dc)

    # pointwise weight (Dc_out, Dc_in, 1, 1) -> (in, out) block-diag over W
    pw_io = jnp.transpose(params["pw_w"][:, :, 0, 0], (1, 0))       # (Dc_in, Dc_out)
    pw_blk = jnp.kron(jnp.eye(W, dtype=jnp.float32), pw_io)         # (W*Dc, W*Dc)
    pwb = jnp.tile(params["pw_b"], W).reshape(1, W * Dc)

    # highway: nn.Linear stores (out, in); fuse [gate | linear] -> (D, 2D), bf16
    hw_w = jnp.stack([jnp.concatenate([params[f"gate_w{i}"].T,
                                       params[f"lin_w{i}"].T], axis=1)
                      for i in range(N_HIGHWAY)]).astype(jnp.bfloat16)   # (2, D, 2D)
    hw_b = jnp.stack([jnp.concatenate([params[f"gate_b{i}"], params[f"lin_b{i}"]])
                      for i in range(N_HIGHWAY)]).reshape(N_HIGHWAY, 1, 2 * D)
    return {"taps": taps, "dwb": dwb, "pw": pw_blk, "pwb": pwb,
            "hw_w": hw_w, "hw_b": hw_b}


# ---------------------------------------------------------------------------
# Wrapper: input-side layout plumbing only, one fused pallas_call
# ---------------------------------------------------------------------------
def embedding_forward(ch_emb, wd_emb, prep):
    """ch_emb: (B, L, W, DCHAR) f32, wd_emb: (B, L, DWORD) f32, prep: prepare_params().
       Returns (B, DCHAR + DWORD, L) f32 (same as the PyTorch module)."""
    B, L, W, Dc = ch_emb.shape
    _, _, Dw = wd_emb.shape
    D = Dc + Dw
    Lp, Wp = L + 2 * PAD, W + 2 * PAD

    # only input plumbing: zero-pad the conv halo and fold (W, Dc) into lanes
    ch_pad = jnp.pad(ch_emb, ((0, 0), (PAD, PAD), (PAD, PAD), (0, 0)))
    ch_pad = ch_pad.reshape(B, Lp, Wp * Dc)

    out = pl.pallas_call(
        _embedding_kernel,
        out_shape=jax.ShapeDtypeStruct((B, L, D), jnp.float32),
        grid=(B,),
        in_specs=[
            pl.BlockSpec((1, Lp, Wp * Dc), lambda b: (b, 0, 0)),     # padded chars
            pl.BlockSpec((1, L, Dw), lambda b: (b, 0, 0)),           # word emb
            # weights: constant index maps -> resident in VMEM across grid steps
            pl.BlockSpec((K * K, W * Dc), lambda b: (0, 0)),
            pl.BlockSpec((1, W * Dc), lambda b: (0, 0)),
            pl.BlockSpec((W * Dc, W * Dc), lambda b: (0, 0)),
            pl.BlockSpec((1, W * Dc), lambda b: (0, 0)),
            pl.BlockSpec((N_HIGHWAY, D, 2 * D), lambda b: (0, 0, 0)),
            pl.BlockSpec((N_HIGHWAY, 1, 2 * D), lambda b: (0, 0, 0)),
        ],
        out_specs=pl.BlockSpec((1, L, D), lambda b: (b, 0, 0)),      # lane-dense out
        compiler_params=pltpu.CompilerParams(
            dimension_semantics=("parallel",),          # 2-TC sharding on v7x
            vmem_limit_bytes=32 * 1024 * 1024),         # headroom beyond v5e default
    )(ch_pad, wd_emb, prep["taps"], prep["dwb"], prep["pw"], prep["pwb"],
      prep["hw_w"], prep["hw_b"])

    # back to the PyTorch output layout (B, D, L)
    return jnp.transpose(out, (0, 2, 1))


# ---------------------------------------------------------------------------
# Pure-JAX reference (mirrors the PyTorch forward, eval mode, HIGHEST precision)
# ---------------------------------------------------------------------------
def _reference_forward(ch_emb, wd_emb, params):
    B, L, W, Dc = ch_emb.shape
    x = jnp.transpose(ch_emb, (0, 3, 1, 2))                       # (B, Dc, L, W)
    x = lax.conv_general_dilated(
        x, params["dw_w"], (1, 1), ((PAD, PAD), (PAD, PAD)),
        feature_group_count=Dc, dimension_numbers=("NCHW", "OIHW", "NCHW"),
        precision=lax.Precision.HIGHEST)
    x = x + params["dw_b"][None, :, None, None]
    x = lax.conv_general_dilated(
        x, params["pw_w"], (1, 1), "VALID",
        dimension_numbers=("NCHW", "OIHW", "NCHW"),
        precision=lax.Precision.HIGHEST)
    x = x + params["pw_b"][None, :, None, None]
    x = jnp.maximum(x, 0.0)
    ch = jnp.max(x, axis=3)                                       # (B, Dc, L)
    wd = jnp.transpose(wd_emb, (0, 2, 1))                         # (B, Dw, L)
    h = jnp.transpose(jnp.concatenate([ch, wd], axis=1), (0, 2, 1))  # (B, L, D)
    for i in range(N_HIGHWAY):
        g = jax.nn.sigmoid(
            jnp.dot(h, params[f"gate_w{i}"].T, precision=lax.Precision.HIGHEST)
            + params[f"gate_b{i}"])
        nl = jnp.maximum(
            jnp.dot(h, params[f"lin_w{i}"].T, precision=lax.Precision.HIGHEST)
            + params[f"lin_b{i}"], 0.0)
        h = g * nl + (1.0 - g) * h
    return jnp.transpose(h, (0, 2, 1))                            # (B, D, L)


if __name__ == "__main__":
    key = jax.random.PRNGKey(0)
    keys = jax.random.split(key, 16)

    B, L, W = 2, 16, 8          # batch, seq_len, chars-per-word
    D = DCHAR + DWORD

    ch_emb = jax.random.normal(keys[0], (B, L, W, DCHAR), dtype=jnp.float32)
    wd_emb = jax.random.normal(keys[1], (B, L, DWORD), dtype=jnp.float32)

    # deterministic synthetic params in PyTorch layouts, kaiming-ish scaling
    params = {
        "dw_w": 0.2 * jax.random.normal(keys[2], (DCHAR, 1, K, K), dtype=jnp.float32),
        "dw_b": 0.1 * jax.random.normal(keys[3], (DCHAR,), dtype=jnp.float32),
        "pw_w": (1.0 / jnp.sqrt(DCHAR)) * jax.random.normal(keys[4], (DCHAR, DCHAR, 1, 1),
                                                            dtype=jnp.float32),
        "pw_b": 0.1 * jax.random.normal(keys[5], (DCHAR,), dtype=jnp.float32),
    }
    for i in range(N_HIGHWAY):
        params[f"gate_w{i}"] = (1.0 / jnp.sqrt(D)) * jax.random.normal(
            keys[6 + 4 * i], (D, D), dtype=jnp.float32)
        params[f"gate_b{i}"] = 0.1 * jax.random.normal(keys[7 + 4 * i], (D,), dtype=jnp.float32)
        params[f"lin_w{i}"] = (1.0 / jnp.sqrt(D)) * jax.random.normal(
            keys[8 + 4 * i], (D, D), dtype=jnp.float32)
        params[f"lin_b{i}"] = 0.1 * jax.random.normal(keys[9 + 4 * i], (D,), dtype=jnp.float32)

    # weight re-layout happens ONCE, outside the jitted hot path
    prep = prepare_params(params, char_limit=W)
    fwd = jax.jit(embedding_forward)

    out = jax.block_until_ready(fwd(ch_emb, wd_emb, prep))
    ref = jax.block_until_ready(_reference_forward(ch_emb, wd_emb, params))

    assert out.shape == (B, D, L), out.shape
    # bf16-input / f32-accumulate highway dots (per perf review, v6e/v7x MXU) +
    # approx EUP reciprocal -> compare against the f32-HIGHEST reference at 2e-2.
    assert jnp.allclose(out, ref, atol=2e-2, rtol=2e-2), float(jnp.max(jnp.abs(out - ref)))

    print("KERNEL_OK")
</pallas_src>

<mosaic_0001>
module attributes {stable_mosaic.version = 11 : i64} {
  func.func @_embedding_kernel(%arg0: i32, %arg1: memref<1x20x384xf32, #tpu.memory_space<vmem>>, %arg2: memref<1x16x96xf32, #tpu.memory_space<vmem>>, %arg3: memref<25x256xf32, #tpu.memory_space<vmem>>, %arg4: memref<1x256xf32, #tpu.memory_space<vmem>>, %arg5: memref<256x256xf32, #tpu.memory_space<vmem>>, %arg6: memref<1x256xf32, #tpu.memory_space<vmem>>, %arg7: memref<2x128x256xbf16, #tpu.memory_space<vmem>>, %arg8: memref<2x1x256xf32, #tpu.memory_space<vmem>>, %arg9: memref<1x16x128xf32, #tpu.memory_space<vmem>>) attributes {dimension_semantics = [#tpu.dimension_semantics<parallel>], iteration_bounds = array<i64: 2>, scalar_prefetch = 0 : i64, scratch_operands = 0 : i64, tpu.core_type = #tpu.core_type<tc>, window_params = [{transform_indices = @transform_0, window_bounds = array<i64: 1, 20, 384>}, {transform_indices = @transform_1, window_bounds = array<i64: 1, 16, 96>}, {pipeline_mode = #tpu.pipeline_mode<synchronous>, transform_indices = @transform_2, window_bounds = array<i64: 25, 256>}, {pipeline_mode = #tpu.pipeline_mode<synchronous>, transform_indices = @transform_3, window_bounds = array<i64: 1, 256>}, {pipeline_mode = #tpu.pipeline_mode<synchronous>, transform_indices = @transform_4, window_bounds = array<i64: 256, 256>}, {pipeline_mode = #tpu.pipeline_mode<synchronous>, transform_indices = @transform_5, window_bounds = array<i64: 1, 256>}, {pipeline_mode = #tpu.pipeline_mode<synchronous>, transform_indices = @transform_6, window_bounds = array<i64: 2, 128, 256>}, {pipeline_mode = #tpu.pipeline_mode<synchronous>, transform_indices = @transform_7, window_bounds = array<i64: 2, 1, 256>}, {transform_indices = @transform_8, window_bounds = array<i64: 1, 16, 128>}]} {
    %c0 = arith.constant 0 : index
    %c0_0 = arith.constant 0 : index
    %c0_1 = arith.constant 0 : index
    %0 = vector.load %arg1[%c0, %c0_0, %c0_1] : memref<1x20x384xf32, #tpu.memory_space<vmem>>, vector<1x20x384xf32>
    %1 = vector.shape_cast %0 : vector<1x20x384xf32> to vector<20x384xf32>
    %c0_2 = arith.constant 0 : index
    %c0_3 = arith.constant 0 : index
    %2 = vector.load %arg3[%c0_2, %c0_3] : memref<25x256xf32, #tpu.memory_space<vmem>>, vector<25x256xf32>
    %cst = arith.constant 0.000000e+00 : f32
    %3 = vector.broadcast %cst : f32 to vector<16x256xf32>
    %c0_4 = arith.constant 0 : index
    %c0_5 = arith.constant 0 : index
    %4 = vector.load %arg4[%c0_4, %c0_5] : memref<1x256xf32, #tpu.memory_space<vmem>>, vector<1x256xf32>
    %5 = vector.broadcast %4 : vector<1x256xf32> to vector<16x256xf32>
    %6 = arith.addf %3, %5 : vector<16x256xf32>
    %7 = vector.extract_strided_slice %1 {offsets = [0, 0], sizes = [16, 384], strides = [1, 1]} : vector<20x384xf32> to vector<16x384xf32>
    %8 = vector.extract_strided_slice %7 {offsets = [0, 0], sizes = [16, 256], strides = [1, 1]} : vector<16x384xf32> to vector<16x256xf32>
    %9 = vector.extract_strided_slice %2 {offsets = [0, 0], sizes = [1, 256], strides = [1, 1]} : vector<25x256xf32> to vector<1x256xf32>
    %10 = vector.broadcast %9 : vector<1x256xf32> to vector<16x256xf32>
    %11 = arith.mulf %8, %10 : vector<16x256xf32>
    %12 = arith.addf %6, %11 : vector<16x256xf32>
    %13 = vector.extract_strided_slice %7 {offsets = [0, 32], sizes = [16, 256], strides = [1, 1]} : vector<16x384xf32> to vector<16x256xf32>
    %14 = vector.extract_strided_slice %2 {offsets = [1, 0], sizes = [1, 256], strides = [1, 1]} : vector<25x256xf32> to vector<1x256xf32>
    %15 = vector.broadcast %14 : vector<1x256xf32> to vector<16x256xf32>
    %16 = arith.mulf %13, %15 : vector<16x256xf32>
    %17 = arith.addf %12, %16 : vector<16x256xf32>
    %18 = vector.extract_strided_slice %7 {offsets = [0, 64], sizes = [16, 256], strides = [1, 1]} : vector<16x384xf32> to vector<16x256xf32>
    %19 = vector.extract_strided_slice %2 {offsets = [2, 0], sizes = [1, 256], strides = [1, 1]} : vector<25x256xf32> to vector<1x256xf32>
    %20 = vector.broadcast %19 : vector<1x256xf32> to vector<16x256xf32>
    %21 = arith.mulf %18, %20 : vector<16x256xf32>
    %22 = arith.addf %17, %21 : vector<16x256xf32>
    %23 = vector.extract_strided_slice %7 {offsets = [0, 96], sizes = [16, 256], strides = [1, 1]} : vector<16x384xf32> to vector<16x256xf32>
    %24 = vector.extract_strided_slice %2 {offsets = [3, 0], sizes = [1, 256], strides = [1, 1]} : vector<25x256xf32> to vector<1x256xf32>
    %25 = vector.broadcast %24 : vector<1x256xf32> to vector<16x256xf32>
    %26 = arith.mulf %23, %25 : vector<16x256xf32>
    %27 = arith.addf %22, %26 : vector<16x256xf32>
    %28 = vector.extract_strided_slice %7 {offsets = [0, 128], sizes = [16, 256], strides = [1, 1]} : vector<16x384xf32> to vector<16x256xf32>
    %29 = vector.extract_strided_slice %2 {offsets = [4, 0], sizes = [1, 256], strides = [1, 1]} : vector<25x256xf32> to vector<1x256xf32>
    %30 = vector.broadcast %29 : vector<1x256xf32> to vector<16x256xf32>
    %31 = arith.mulf %28, %30 : vector<16x256xf32>
    %32 = arith.addf %27, %31 : vector<16x256xf32>
    %33 = vector.extract_strided_slice %1 {offsets = [1, 0], sizes = [16, 384], strides = [1, 1]} : vector<20x384xf32> to vector<16x384xf32>
    %34 = vector.extract_strided_slice %33 {offsets = [0, 0], sizes = [16, 256], strides = [1, 1]} : vector<16x384xf32> to vector<16x256xf32>
    %35 = vector.extract_strided_slice %2 {offsets = [5, 0], sizes = [1, 256], strides = [1, 1]} : vector<25x256xf32> to vector<1x256xf32>
    %36 = vector.broadcast %35 : vector<1x256xf32> to vector<16x256xf32>
    %37 = arith.mulf %34, %36 : vector<16x256xf32>
    %38 = arith.addf %32, %37 : vector<16x256xf32>
    %39 = vector.extract_strided_slice %33 {offsets = [0, 32], sizes = [16, 256], strides = [1, 1]} : vector<16x384xf32> to vector<16x256xf32>
    %40 = vector.extract_strided_slice %2 {offsets = [6, 0], sizes = [1, 256], strides = [1, 1]} : vector<25x256xf32> to vector<1x256xf32>
    %41 = vector.broadcast %40 : vector<1x256xf32> to vector<16x256xf32>
    %42 = arith.mulf %39, %41 : vector<16x256xf32>
    %43 = arith.addf %38, %42 : vector<16x256xf32>
    %44 = vector.extract_strided_slice %33 {offsets = [0, 64], sizes = [16, 256], strides = [1, 1]} : vector<16x384xf32> to vector<16x256xf32>
    %45 = vector.extract_strided_slice %2 {offsets = [7, 0], sizes = [1, 256], strides = [1, 1]} : vector<25x256xf32> to vector<1x256xf32>
    %46 = vector.broadcast %45 : vector<1x256xf32> to vector<16x256xf32>
    %47 = arith.mulf %44, %46 : vector<16x256xf32>
    %48 = arith.addf %43, %47 : vector<16x256xf32>
    %49 = vector.extract_strided_slice %33 {offsets = [0, 96], sizes = [16, 256], strides = [1, 1]} : vector<16x384xf32> to vector<16x256xf32>
    %50 = vector.extract_strided_slice %2 {offsets = [8, 0], sizes = [1, 256], strides = [1, 1]} : vector<25x256xf32> to vector<1x256xf32>
    %51 = vector.broadcast %50 : vector<1x256xf32> to vector<16x256xf32>
    %52 = arith.mulf %49, %51 : vector<16x256xf32>
    %53 = arith.addf %48, %52 : vector<16x256xf32>
    %54 = vector.extract_strided_slice %33 {offsets = [0, 128], sizes = [16, 256], strides = [1, 1]} : vector<16x384xf32> to vector<16x256xf32>
    %55 = vector.extract_strided_slice %2 {offsets = [9, 0], sizes = [1, 256], strides = [1, 1]} : vector<25x256xf32> to vector<1x256xf32>
    %56 = vector.broadcast %55 : vector<1x256xf32> to vector<16x256xf32>
    %57 = arith.mulf %54, %56 : vector<16x256xf32>
    %58 = arith.addf %53, %57 : vector<16x256xf32>
    %59 = vector.extract_strided_slice %1 {offsets = [2, 0], sizes = [16, 384], strides = [1, 1]} : vector<20x384xf32> to vector<16x384xf32>
    %60 = vector.extract_strided_slice %59 {offsets = [0, 0], sizes = [16, 256], strides = [1, 1]} : vector<16x384xf32> to vector<16x256xf32>
    %61 = vector.extract_strided_slice %2 {offsets = [10, 0], sizes = [1, 256], strides = [1, 1]} : vector<25x256xf32> to vector<1x256xf32>
    %62 = vector.broadcast %61 : vector<1x256xf32> to vector<16x256xf32>
    %63 = arith.mulf %60, %62 : vector<16x256xf32>
    %64 = arith.addf %58, %63 : vector<16x256xf32>
    %65 = vector.extract_strided_slice %59 {offsets = [0, 32], sizes = [16, 256], strides = [1, 1]} : vector<16x384xf32> to vector<16x256xf32>
    %66 = vector.extract_strided_slice %2 {offsets = [11, 0], sizes = [1, 256], strides = [1, 1]} : vector<25x256xf32> to vector<1x256xf32>
    %67 = vector.broadcast %66 : vector<1x256xf32> to vector<16x256xf32>
    %68 = arith.mulf %65, %67 : vector<16x256xf32>
    %69 = arith.addf %64, %68 : vector<16x256xf32>
    %70 = vector.extract_strided_slice %59 {offsets = [0, 64], sizes = [16, 256], strides = [1, 1]} : vector<16x384xf32> to vector<16x256xf32>
    %71 = vector.extract_strided_slice %2 {offsets = [12, 0], sizes = [1, 256], strides = [1, 1]} : vector<25x256xf32> to vector<1x256xf32>
    %72 = vector.broadcast %71 : vector<1x256xf32> to vector<16x256xf32>
    %73 = arith.mulf %70, %72 : vector<16x256xf32>
    %74 = arith.addf %69, %73 : vector<16x256xf32>
    %75 = vector.extract_strided_slice %59 {offsets = [0, 96], sizes = [16, 256], strides = [1, 1]} : vector<16x384xf32> to vector<16x256xf32>
    %76 = vector.extract_strided_slice %2 {offsets = [13, 0], sizes = [1, 256], strides = [1, 1]} : vector<25x256xf32> to vector<1x256xf32>
    %77 = vector.broadcast %76 : vector<1x256xf32> to vector<16x256xf32>
    %78 = arith.mulf %75, %77 : vector<16x256xf32>
    %79 = arith.addf %74, %78 : vector<16x256xf32>
    %80 = vector.extract_strided_slice %59 {offsets = [0, 128], sizes = [16, 256], strides = [1, 1]} : vector<16x384xf32> to vector<16x256xf32>
    %81 = vector.extract_strided_slice %2 {offsets = [14, 0], sizes = [1, 256], strides = [1, 1]} : vector<25x256xf32> to vector<1x256xf32>
    %82 = vector.broadcast %81 : vector<1x256xf32> to vector<16x256xf32>
    %83 = arith.mulf %80, %82 : vector<16x256xf32>
    %84 = arith.addf %79, %83 : vector<16x256xf32>
    %85 = vector.extract_strided_slice %1 {offsets = [3, 0], sizes = [16, 384], strides = [1, 1]} : vector<20x384xf32> to vector<16x384xf32>
    %86 = vector.extract_strided_slice %85 {offsets = [0, 0], sizes = [16, 256], strides = [1, 1]} : vector<16x384xf32> to vector<16x256xf32>
    %87 = vector.extract_strided_slice %2 {offsets = [15, 0], sizes = [1, 256], strides = [1, 1]} : vector<25x256xf32> to vector<1x256xf32>
    %88 = vector.broadcast %87 : vector<1x256xf32> to vector<16x256xf32>
    %89 = arith.mulf %86, %88 : vector<16x256xf32>
    %90 = arith.addf %84, %89 : vector<16x256xf32>
    %91 = vector.extract_strided_slice %85 {offsets = [0, 32], sizes = [16, 256], strides = [1, 1]} : vector<16x384xf32> to vector<16x256xf32>
    %92 = vector.extract_strided_slice %2 {offsets = [16, 0], sizes = [1, 256], strides = [1, 1]} : vector<25x256xf32> to vector<1x256xf32>
    %93 = vector.broadcast %92 : vector<1x256xf32> to vector<16x256xf32>
    %94 = arith.mulf %91, %93 : vector<16x256xf32>
    %95 = arith.addf %90, %94 : vector<16x256xf32>
    %96 = vector.extract_strided_slice %85 {offsets = [0, 64], sizes = [16, 256], strides = [1, 1]} : vector<16x384xf32> to vector<16x256xf32>
    %97 = vector.extract_strided_slice %2 {offsets = [17, 0], sizes = [1, 256], strides = [1, 1]} : vector<25x256xf32> to vector<1x256xf32>
    %98 = vector.broadcast %97 : vector<1x256xf32> to vector<16x256xf32>
    %99 = arith.mulf %96, %98 : vector<16x256xf32>
    %100 = arith.addf %95, %99 : vector<16x256xf32>
    %101 = vector.extract_strided_slice %85 {offsets = [0, 96], sizes = [16, 256], strides = [1, 1]} : vector<16x384xf32> to vector<16x256xf32>
    %102 = vector.extract_strided_slice %2 {offsets = [18, 0], sizes = [1, 256], strides = [1, 1]} : vector<25x256xf32> to vector<1x256xf32>
    %103 = vector.broadcast %102 : vector<1x256xf32> to vector<16x256xf32>
    %104 = arith.mulf %101, %103 : vector<16x256xf32>
    %105 = arith.addf %100, %104 : vector<16x256xf32>
    %106 = vector.extract_strided_slice %85 {offsets = [0, 128], sizes = [16, 256], strides = [1, 1]} : vector<16x384xf32> to vector<16x256xf32>
    %107 = vector.extract_strided_slice %2 {offsets = [19, 0], sizes = [1, 256], strides = [1, 1]} : vector<25x256xf32> to vector<1x256xf32>
    %108 = vector.broadcast %107 : vector<1x256xf32> to vector<16x256xf32>
    %109 = arith.mulf %106, %108 : vector<16x256xf32>
    %110 = arith.addf %105, %109 : vector<16x256xf32>
    %111 = vector.extract_strided_slice %1 {offsets = [4, 0], sizes = [16, 384], strides = [1, 1]} : vector<20x384xf32> to vector<16x384xf32>
    %112 = vector.extract_strided_slice %111 {offsets = [0, 0], sizes = [16, 256], strides = [1, 1]} : vector<16x384xf32> to vector<16x256xf32>
    %113 = vector.extract_strided_slice %2 {offsets = [20, 0], sizes = [1, 256], strides = [1, 1]} : vector<25x256xf32> to vector<1x256xf32>
    %114 = vector.broadcast %113 : vector<1x256xf32> to vector<16x256xf32>
    %115 = arith.mulf %112, %114 : vector<16x256xf32>
    %116 = arith.addf %110, %115 : vector<16x256xf32>
    %117 = vector.extract_strided_slice %111 {offsets = [0, 32], sizes = [16, 256], strides = [1, 1]} : vector<16x384xf32> to vector<16x256xf32>
    %118 = vector.extract_strided_slice %2 {offsets = [21, 0], sizes = [1, 256], strides = [1, 1]} : vector<25x256xf32> to vector<1x256xf32>
    %119 = vector.broadcast %118 : vector<1x256xf32> to vector<16x256xf32>
    %120 = arith.mulf %117, %119 : vector<16x256xf32>
    %121 = arith.addf %116, %120 : vector<16x256xf32>
    %122 = vector.extract_strided_slice %111 {offsets = [0, 64], sizes = [16, 256], strides = [1, 1]} : vector<16x384xf32> to vector<16x256xf32>
    %123 = vector.extract_strided_slice %2 {offsets = [22, 0], sizes = [1, 256], strides = [1, 1]} : vector<25x256xf32> to vector<1x256xf32>
    %124 = vector.broadcast %123 : vector<1x256xf32> to vector<16x256xf32>
    %125 = arith.mulf %122, %124 : vector<16x256xf32>
    %126 = arith.addf %121, %125 : vector<16x256xf32>
    %127 = vector.extract_strided_slice %111 {offsets = [0, 96], sizes = [16, 256], strides = [1, 1]} : vector<16x384xf32> to vector<16x256xf32>
    %128 = vector.extract_strided_slice %2 {offsets = [23, 0], sizes = [1, 256], strides = [1, 1]} : vector<25x256xf32> to vector<1x256xf32>
    %129 = vector.broadcast %128 : vector<1x256xf32> to vector<16x256xf32>
    %130 = arith.mulf %127, %129 : vector<16x256xf32>
    %131 = arith.addf %126, %130 : vector<16x256xf32>
    %132 = vector.extract_strided_slice %111 {offsets = [0, 128], sizes = [16, 256], strides = [1, 1]} : vector<16x384xf32> to vector<16x256xf32>
    %133 = vector.extract_strided_slice %2 {offsets = [24, 0], sizes = [1, 256], strides = [1, 1]} : vector<25x256xf32> to vector<1x256xf32>
    %134 = vector.broadcast %133 : vector<1x256xf32> to vector<16x256xf32>
    %135 = arith.mulf %132, %134 : vector<16x256xf32>
    %136 = arith.addf %131, %135 : vector<16x256xf32>
    %c0_6 = arith.constant 0 : index
    %c0_7 = arith.constant 0 : index
    %137 = vector.load %arg5[%c0_6, %c0_7] : memref<256x256xf32, #tpu.memory_space<vmem>>, vector<256x256xf32>
    %cst_8 = arith.constant dense<0.000000e+00> : vector<16x256xf32>
    %138 = tpu.matmul %136, %137, %cst_8 {dimension_numbers = #tpu.dot_dimension_numbers<[1], [0], [0], [1], [0, 0, 1, 1], [], []>} : vector<16x256xf32>, vector<256x256xf32>, vector<16x256xf32> -> vector<16x256xf32>
    %c0_9 = arith.constant 0 : index
    %c0_10 = arith.constant 0 : index
    %139 = vector.load %arg6[%c0_9, %c0_10] : memref<1x256xf32, #tpu.memory_space<vmem>>, vector<1x256xf32>
    %140 = vector.broadcast %139 : vector<1x256xf32> to vector<16x256xf32>
    %141 = arith.addf %138, %140 : vector<16x256xf32>
    %cst_11 = arith.constant 0.000000e+00 : f32
    %142 = vector.broadcast %cst_11 : f32 to vector<16x256xf32>
    %143 = arith.maximumf %141, %142 : vector<16x256xf32>
    %144 = vector.extract_strided_slice %143 {offsets = [0, 0], sizes = [16, 32], strides = [1, 1]} : vector<16x256xf32> to vector<16x32xf32>
    %145 = vector.extract_strided_slice %143 {offsets = [0, 32], sizes = [16, 32], strides = [1, 1]} : vector<16x256xf32> to vector<16x32xf32>
    %146 = arith.maximumf %144, %145 : vector<16x32xf32>
    %147 = vector.extract_strided_slice %143 {offsets = [0, 64], sizes = [16, 32], strides = [1, 1]} : vector<16x256xf32> to vector<16x32xf32>
    %148 = arith.maximumf %146, %147 : vector<16x32xf32>
    %149 = vector.extract_strided_slice %143 {offsets = [0, 96], sizes = [16, 32], strides = [1, 1]} : vector<16x256xf32> to vector<16x32xf32>
    %150 = arith.maximumf %148, %149 : vector<16x32xf32>
    %151 = vector.extract_strided_slice %143 {offsets = [0, 128], sizes = [16, 32], strides = [1, 1]} : vector<16x256xf32> to vector<16x32xf32>
    %152 = arith.maximumf %150, %151 : vector<16x32xf32>
    %153 = vector.extract_strided_slice %143 {offsets = [0, 160], sizes = [16, 32], strides = [1, 1]} : vector<16x256xf32> to vector<16x32xf32>
    %154 = arith.maximumf %152, %153 : vector<16x32xf32>
    %155 = vector.extract_strided_slice %143 {offsets = [0, 192], sizes = [16, 32], strides = [1, 1]} : vector<16x256xf32> to vector<16x32xf32>
    %156 = arith.maximumf %154, %155 : vector<16x32xf32>
    %157 = vector.extract_strided_slice %143 {offsets = [0, 224], sizes = [16, 32], strides = [1, 1]} : vector<16x256xf32> to vector<16x32xf32>
    %158 = arith.maximumf %156, %157 : vector<16x32xf32>
    %c0_12 = arith.constant 0 : index
    %c0_13 = arith.constant 0 : index
    %c0_14 = arith.constant 0 : index
    %159 = vector.load %arg2[%c0_12, %c0_13, %c0_14] : memref<1x16x96xf32, #tpu.memory_space<vmem>>, vector<1x16x96xf32>
    %160 = vector.shape_cast %159 : vector<1x16x96xf32> to vector<16x96xf32>
    %161 = tpu.concatenate %158, %160 in 1 : vector<16x32xf32>, vector<16x96xf32> -> vector<16x128xf32>
    %162 = arith.truncf %161 : vector<16x128xf32> to vector<16x128xbf16>
    %c0_15 = arith.constant 0 : index
    %c0_16 = arith.constant 0 : index
    %c0_17 = arith.constant 0 : index
    %163 = vector.load %arg7[%c0_15, %c0_16, %c0_17] : memref<2x128x256xbf16, #tpu.memory_space<vmem>>, vector<1x128x256xbf16>
    %164 = vector.shape_cast %163 : vector<1x128x256xbf16> to vector<128x256xbf16>
    %cst_18 = arith.constant dense<0.000000e+00> : vector<16x256xf32>
    %165 = tpu.matmul %162, %164, %cst_18 {dimension_numbers = #tpu.dot_dimension_numbers<[1], [0], [0], [1], [0, 0, 1, 1], [], []>} : vector<16x128xbf16>, vector<128x256xbf16>, vector<16x256xf32> -> vector<16x256xf32>
    %c0_19 = arith.constant 0 : index
    %c0_20 = arith.constant 0 : index
    %c0_21 = arith.constant 0 : index
    %166 = vector.load %arg8[%c0_19, %c0_20, %c0_21] : memref<2x1x256xf32, #tpu.memory_space<vmem>>, vector<1x1x256xf32>
    %167 = vector.shape_cast %166 : vector<1x1x256xf32> to vector<1x256xf32>
    %168 = vector.broadcast %167 : vector<1x256xf32> to vector<16x256xf32>
    %169 = arith.addf %165, %168 : vector<16x256xf32>
    %170 = vector.extract_strided_slice %169 {offsets = [0, 0], sizes = [16, 128], strides = [1, 1]} : vector<16x256xf32> to vector<16x128xf32>
    %cst_22 = arith.constant 0.000000e+00 : f32
    %171 = vector.broadcast %cst_22 : f32 to vector<16x128xf32>
    %172 = arith.subf %171, %170 : vector<16x128xf32>
    %173 = math.exp %172 : vector<16x128xf32>
    %cst_23 = arith.constant 1.000000e+00 : f32
    %174 = vector.broadcast %cst_23 : f32 to vector<16x128xf32>
    %175 = arith.addf %174, %173 : vector<16x128xf32>
    %176 = tpu.reciprocal %175 {approx = true} : vector<16x128xf32> -> vector<16x128xf32>
    %177 = vector.extract_strided_slice %169 {offsets = [0, 128], sizes = [16, 128], strides = [1, 1]} : vector<16x256xf32> to vector<16x128xf32>
    %cst_24 = arith.constant 0.000000e+00 : f32
    %178 = vector.broadcast %cst_24 : f32 to vector<16x128xf32>
    %179 = arith.maximumf %177, %178 : vector<16x128xf32>
    %180 = arith.subf %179, %161 : vector<16x128xf32>
    %181 = arith.mulf %176, %180 : vector<16x128xf32>
    %182 = arith.addf %161, %181 : vector<16x128xf32>
    %183 = arith.truncf %182 : vector<16x128xf32> to vector<16x128xbf16>
    %c1 = arith.constant 1 : index
    %c0_25 = arith.constant 0 : index
    %c0_26 = arith.constant 0 : index
    %184 = vector.load %arg7[%c1, %c0_25, %c0_26] : memref<2x128x256xbf16, #tpu.memory_space<vmem>>, vector<1x128x256xbf16>
    %185 = vector.shape_cast %184 : vector<1x128x256xbf16> to vector<128x256xbf16>
    %cst_27 = arith.constant dense<0.000000e+00> : vector<16x256xf32>
    %186 = tpu.matmul %183, %185, %cst_27 {dimension_numbers = #tpu.dot_dimension_numbers<[1], [0], [0], [1], [0, 0, 1, 1], [], []>} : vector<16x128xbf16>, vector<128x256xbf16>, vector<16x256xf32> -> vector<16x256xf32>
    %c1_28 = arith.constant 1 : index
    %c0_29 = arith.constant 0 : index
    %c0_30 = arith.constant 0 : index
    %187 = vector.load %arg8[%c1_28, %c0_29, %c0_30] : memref<2x1x256xf32, #tpu.memory_space<vmem>>, vector<1x1x256xf32>
    %188 = vector.shape_cast %187 : vector<1x1x256xf32> to vector<1x256xf32>
    %189 = vector.broadcast %188 : vector<1x256xf32> to vector<16x256xf32>
    %190 = arith.addf %186, %189 : vector<16x256xf32>
    %191 = vector.extract_strided_slice %190 {offsets = [0, 0], sizes = [16, 128], strides = [1, 1]} : vector<16x256xf32> to vector<16x128xf32>
    %cst_31 = arith.constant 0.000000e+00 : f32
    %192 = vector.broadcast %cst_31 : f32 to vector<16x128xf32>
    %193 = arith.subf %192, %191 : vector<16x128xf32>
    %194 = math.exp %193 : vector<16x128xf32>
    %cst_32 = arith.constant 1.000000e+00 : f32
    %195 = vector.broadcast %cst_32 : f32 to vector<16x128xf32>
    %196 = arith.addf %195, %194 : vector<16x128xf32>
    %197 = tpu.reciprocal %196 {approx = true} : vector<16x128xf32> -> vector<16x128xf32>
    %198 = vector.extract_strided_slice %190 {offsets = [0, 128], sizes = [16, 128], strides = [1, 1]} : vector<16x256xf32> to vector<16x128xf32>
    %cst_33 = arith.constant 0.000000e+00 : f32
    %199 = vector.broadcast %cst_33 : f32 to vector<16x128xf32>
    %200 = arith.maximumf %198, %199 : vector<16x128xf32>
    %201 = arith.subf %200, %182 : vector<16x128xf32>
    %202 = arith.mulf %197, %201 : vector<16x128xf32>
    %203 = arith.addf %182, %202 : vector<16x128xf32>
    %c0_34 = arith.constant 0 : index
    %c0_35 = arith.constant 0 : index
    %c0_36 = arith.constant 0 : index
    %204 = vector.load %arg9[%c0_34, %c0_35, %c0_36] : memref<1x16x128xf32, #tpu.memory_space<vmem>>, vector<1x16x128xf32>
    %205 = vector.shape_cast %204 : vector<1x16x128xf32> to vector<16x128xf32>
    %206 = vector.shape_cast %203 : vector<16x128xf32> to vector<1x16x128xf32>
    tpu.vector_store %arg9[%c0_34, %c0_35, %c0_36], %206 {strides = array<i32>} : memref<1x16x128xf32, #tpu.memory_space<vmem>>, vector<1x16x128xf32>,
    return
  }
  func.func @transform_0(%arg0: i32) -> (i32, i32, i32) {
    %c0_i32 = arith.constant 0 : i32
    %c0_i32_0 = arith.constant 0 : i32
    %c0_i32_1 = arith.constant 0 : i32
    return %arg0, %c0_i32, %c0_i32_0 : i32, i32, i32
  }
  func.func @transform_1(%arg0: i32) -> (i32, i32, i32) {
    %c0_i32 = arith.constant 0 : i32
    %c0_i32_0 = arith.constant 0 : i32
    %c0_i32_1 = arith.constant 0 : i32
    return %arg0, %c0_i32, %c0_i32_0 : i32, i32, i32
  }
  func.func @transform_2(%arg0: i32) -> (i32, i32) {
    %c0_i32 = arith.constant 0 : i32
    %c0_i32_0 = arith.constant 0 : i32
    %c0_i32_1 = arith.constant 0 : i32
    return %c0_i32, %c0_i32_0 : i32, i32
  }
  func.func @transform_3(%arg0: i32) -> (i32, i32) {
    %c0_i32 = arith.constant 0 : i32
    %c0_i32_0 = arith.constant 0 : i32
    %c0_i32_1 = arith.constant 0 : i32
    return %c0_i32, %c0_i32_0 : i32, i32
  }
  func.func @transform_4(%arg0: i32) -> (i32, i32) {
    %c0_i32 = arith.constant 0 : i32
    %c0_i32_0 = arith.constant 0 : i32
    %c0_i32_1 = arith.constant 0 : i32
    return %c0_i32, %c0_i32_0 : i32, i32
  }
  func.func @transform_5(%arg0: i32) -> (i32, i32) {
    %c0_i32 = arith.constant 0 : i32
    %c0_i32_0 = arith.constant 0 : i32
    %c0_i32_1 = arith.constant 0 : i32
    return %c0_i32, %c0_i32_0 : i32, i32
  }
  func.func @transform_6(%arg0: i32) -> (i32, i32, i32) {
    %c0_i32 = arith.constant 0 : i32
    %c0_i32_0 = arith.constant 0 : i32
    %c0_i32_1 = arith.constant 0 : i32
    %c0_i32_2 = arith.constant 0 : i32
    return %c0_i32, %c0_i32_0, %c0_i32_1 : i32, i32, i32
  }
  func.func @transform_7(%arg0: i32) -> (i32, i32, i32) {
    %c0_i32 = arith.constant 0 : i32
    %c0_i32_0 = arith.constant 0 : i32
    %c0_i32_1 = arith.constant 0 : i32
    %c0_i32_2 = arith.constant 0 : i32
    return %c0_i32, %c0_i32_0, %c0_i32_1 : i32, i32, i32
  }
  func.func @transform_8(%arg0: i32) -> (i32, i32, i32) {
    %c0_i32 = arith.constant 0 : i32
    %c0_i32_0 = arith.constant 0 : i32
    %c0_i32_1 = arith.constant 0 : i32
    return %arg0, %c0_i32, %c0_i32_0 : i32, i32, i32
  }
}

</mosaic_0001>

<bundles_post_ra>
// kernel: embedding_forward.1
= control target key start
LH: loop header
LB: loop body
LE: loop exit
PB: predicated region body
PF: predicated region fallthrough
CT: control target
= control target key end

     0   :  { %13 = vsyncpa [#allocation3], 0  ;;  %s4535_s0 = inlined_call_operand.vmem [shape: f32[2,20,384], index: 0, kind: input, shape index: {}]   ;;  %s4536_s1 = inlined_call_operand.vmem [shape: f32[2,16,96], index: 1, kind: input, shape index: {}]   ;;  %s4537_s2 = inlined_call_operand.vmem [shape: f32[25,256], index: 2, kind: input, shape index: {}]   ;;  %s4538_s3 = inlined_call_operand.vmem [shape: f32[1,256], index: 3, kind: input, shape index: {}]   ;;  %s4539_s4 = inlined_call_operand.vmem [shape: f32[256,256], index: 4, kind: input, shape index: {}]   ;;  %s4540_s5 = inlined_call_operand.vmem [shape: f32[1,256], index: 5, kind: input, shape index: {}]   ;;  %s4541_s6 = inlined_call_operand.vmem [shape: bf16[2,128,256], index: 6, kind: input, shape index: {}]   ;;  %s4542_s7 = inlined_call_operand.vmem [shape: f32[2,1,256], index: 7, kind: input, shape index: {}]   ;;  %s4543_s8 = inlined_call_operand.hbm [shape: f32[2,16,128], index: 8, kind: output, shape index: {}]  }
   0x1   :  { %15 = vsyncpa [#allocation3 + $0x1], 0  ;;  %s2787_s27 = smov 0   ;;  %s2789_s28 = smov 0  }
   0x2   :  { %s2791_s29 = smov 0   ;;  %s2793_s30 = smov 0  }
   0x3 LB: > { %s2808_s9 = sadd.s32 4294967295, %s2733_s30   ;;  %s2416_s10 = sadd.s32 4294967294, %s2733_s30   ;;  %s2733_s30 = sphi %s2793_s30, %s4610_s30   ;;  %s2729_s29 = sphi %s2791_s29, %s4609_s29   ;;  %s2725_s28 = sphi %s2789_s28, %s4608_s28   ;;  %s2721_s27 = sphi %s2787_s27, %s4607_s27  }
   0x4   : > { %s2812_s11 = sadd.s32 1, %s2733_s30   ;;  %s206_s12 = sadd.s32 1, %s2729_s29 }
   0x5   : > { %s203_s13 = ssub.s32 %s2733_s30, %s2812_s11  ;;  %p216_p0 = scmp.ne.s32.totalorder %s2729_s29, %s2725_s28 }
   0x6   : > { %p204_p1 = scmp.eq.s32.totalorder %s203_s13, 0  ;;  %p217_p2 = scmp.eq.s32.totalorder %s2808_s9, 1 }
   0x7   : > { %p222_p3 = scmp.ne.s32.totalorder %s2725_s28, %s2721_s27  ;;  %p223_p4 = scmp.eq.s32.totalorder %s2416_s10, 1 }
   0x8   : > { %s2823_s14 = scalar_select %p204_p1, %s2729_s29, %s206_s12  }
   0x9   : > { %p2825_p5 = por %p217_p2, %p216_p0  ;;  %p2829_p6 = por %p223_p4, %p222_p3 }
   0xa   : > { %p2419_p7 = scmp.ge.s32.totalorder %s2733_s30, 1  ;;  %p275_p8 = scmp.lt.s32.totalorder %s2733_s30, 3 }
   0xc   : > { %p276_p9 = pnand %p2419_p7, %p275_p8 }
   0xe   : > { %279 = sbr.rel (%p276_p9) target bundleno = 1317 (0x525), region = 52 }
  0x15   : > { %v344_v0 = vlaneseq  ;;  %v2838_v1 = vld [vmem:[%s4537_s2] sm:$0xff]  ;;  %v2847_v5 = vld [vmem:[%s4537_s2 + $0x8] sm:$0xff]  ;;  %s2735_s21 = smov 64   ;;  %s2736_s22 = smov 32   ;;  %v337_v20 = vld [vmem:[%s4537_s2 + $0x18] sm:$0xff]  ;;  %vm386_vm0 = vcmask 261120  }
  0x16   : > { %s4568_s23 = smov 96   ;;  %v336_v21 = vld [vmem:[%s4537_s2 + $0x10] sm:$0xff]  ;;  %v338_v32 = vld [vmem:[%s4537_s2 + $0x20] sm:$0xff]  ;;  %v339_v33 = vld [vmem:[%s4537_s2 + $0x28] sm:$0xff]  ;;  %p314_p10 = scmp.lt.s32.totalorder %s2808_s9, 1  ;;  %vm415_vm1 = vcmask 785408  }
  0x17   : > { %v345_v2 = vshrl.u32 %v344_v0, 7  ;;  %vm442_vm2 = vcmask 523264   ;;  %vm573_vm3 = vcmask 1046528   ;;  %vm875_vm4 = vcmask 1045504   ;;  %s311_s24 = sand.u32 1, %s2725_s28  }
  0x18   : > { %s2945_s19 = scalar_select %p314_p10, %s2808_s9, 1  ;;  %vm1177_vm5 = vcmask 1044480   ;;  %vm1479_vm6 = vcmask 1043456  }
  0x19   : > { %v2840_v3 = vsub.s32 2, %v345_v2  ;;  %v2842_v4 = vsub.s32 1, %v345_v2  ;;  %v2859_v10 = vsub.s32 3, %v345_v2  ;;  %v2867_v13 = vsub.s32 6, %v345_v2  ;;  %s2420_s10 = sshll.u32 %s311_s24, 4  ;;  %s4494_s17 = scalar_lea.sflag [#allocation3], %s311_s24 }
  0x1a   : > { %v2875_v16 = vsub.s32 7, %v345_v2  ;;  %v2883_v19 = vsub.s32 0, %v345_v2  ;;  %v2899_v26 = vsub.s32 4, %v345_v2  ;;  %v2905_v29 = vsub.s32 5, %v345_v2  ;;  %s2546_s20 = smul.u32 72, %s2945_s19  ;;  %s2480_s25 = sshll.u32 %s2945_s19, 4 }
  0x1b   : > { %4571 = vst [vmem:[#allocation5_spill] sm:$0xff] %v2840_v3  ;;  %4572 = vst [vmem:[#allocation6_spill] sm:$0xff] %v2842_v4  ;;  %v431_v6 = vrot.slane %v2838_v1, %v2840_v3  ;;  %v375_v7 = vrot.slane %v2838_v1, %v2842_v4  ;;  %v435_v8 = vrot.slane %v2847_v5, %v2840_v3  ;;  %s323_s18 = scalar_lea.vmem %s4536_s1, %s2480_s25  ;;  %s4606_s25 = smov 96  }
  0x1c   : > { %v379_v9 = vrot.slane %v2847_v5, %v2842_v4  ;;  %4573 = vst [vmem:[#allocation7_spill] sm:$0xff] %v2859_v10  ;;  %v490_v11 = vrot.slane %v2847_v5, %v2859_v10  ;;  %v486_v12 = vrot.slane %v2838_v1, %v2859_v10  ;;  %4574 = vst [vmem:[#allocation8_spill] sm:$0xff] %v2867_v13  ;;  %s2951_s26 = scalar_lea.vmem %s4535_s0, %s2546_s20 }
  0x1d   : > { %438 = vrot.lane.b32.xlu1 %v431_v6, %s2735_s21  ;;  %382 = vrot.lane.b32.xlu0 %v375_v7, %s2736_s22  ;;  %v599_v14 = vrot.slane %v2847_v5, %v2867_v13  ;;  %v595_v15 = vrot.slane %v2838_v1, %v2867_v13  ;;  %4575 = vst [vmem:[#allocation9_spill] sm:$0xff] %v2875_v16  ;;  %4576 = vst [vmem:[#allocation10_spill] sm:$0xff] %v2883_v19  ;;  %v2954_v46 = vld [vmem:[%s2951_s26] sm:$0xff]  ;;  %v2958_v50 = vld [vmem:[%s2951_s26 + $0x10] sm:$0xff] }
  0x1e   : > { %v674_v17 = vrot.slane %v2847_v5, %v2875_v16  ;;  %v670_v18 = vrot.slane %v2838_v1, %v2875_v16  ;;  %v749_v22 = vrot.slane %v337_v20, %v2883_v19  ;;  %v745_v23 = vrot.slane %v336_v21, %v2883_v19  ;;  %4577 = vst [vmem:[#allocation11_spill] sm:$0xff] %v2899_v26  ;;  %v2964_v55 = vld [vmem:[%s2951_s26 + $0x18] sm:$0xff]  ;;  %v2971_v58 = vld [vmem:[%s2951_s26 + $0x28] sm:$0xff] }
  0x1f   : > { %v901_v24 = vrot.slane %v337_v20, %v2859_v10  ;;  %v897_v25 = vrot.slane %v336_v21, %v2859_v10  ;;  %v976_v27 = vrot.slane %v337_v20, %v2899_v26  ;;  %v972_v28 = vrot.slane %v336_v21, %v2899_v26  ;;  %v2982_v0 = vld [vmem:[%s2951_s26 + $0x8] sm:$0xff] }
  0x20   : > { %v1051_v30 = vrot.slane %v337_v20, %v2905_v29  ;;  %v1047_v31 = vrot.slane %v336_v21, %v2905_v29  ;;  %v1199_v34 = vrot.slane %v338_v32, %v2883_v19  ;;  %v1203_v35 = vrot.slane %v339_v33, %v2883_v19 }
  0x21   : > { %440 = vrot.lane.b32.xlu1 %v435_v8, %s2735_s21  ;;  %384 = vrot.lane.b32.xlu0 %v379_v9, %s2736_s22  ;;  %v1274_v36 = vrot.slane %v338_v32, %v2842_v4  ;;  %v1278_v37 = vrot.slane %v339_v33, %v2842_v4  ;;  %v1349_v38 = vrot.slane %v338_v32, %v2840_v3  ;;  %v2990_v9 = vld [vmem:[%s2951_s26 + $0x20] sm:$0xff] }
  0x22   : > { %v1353_v39 = vrot.slane %v339_v33, %v2840_v3  ;;  %v1501_v40 = vrot.slane %v338_v32, %v2905_v29  ;;  %v1505_v41 = vrot.slane %v339_v33, %v2905_v29  ;;  %v1576_v42 = vrot.slane %v338_v32, %v2867_v13 }
  0x23   : > { %v1580_v43 = vrot.slane %v339_v33, %v2867_v13  ;;  %v1651_v44 = vrot.slane %v338_v32, %v2875_v16  ;;  %v1655_v45 = vrot.slane %v339_v33, %v2875_v16 }
  0x25   : > { %495 = vrot.lane.b32.xlu1 %v490_v11, %s4568_s23  ;;  %493 = vrot.lane.b32.xlu0 %v486_v12, %s4568_s23 }
  0x29   : > { %604 = vrot.lane.b32.xlu1 %v599_v14, %s2736_s22  ;;  %602 = vrot.lane.b32.xlu0 %v595_v15, %s2736_s22 }
  0x2d   : > { %679 = vrot.lane.b32.xlu1 %v674_v17, %s2735_s21  ;;  %677 = vrot.lane.b32.xlu0 %v670_v18, %s2735_s21 }
  0x31   : > { %754 = vrot.lane.b32.xlu1 %v749_v22, %s4568_s23  ;;  %752 = vrot.lane.b32.xlu0 %v745_v23, %s4568_s23 }
  0x35   : > { %906 = vrot.lane.b32.xlu1 %v901_v24, %s2736_s22  ;;  %904 = vrot.lane.b32.xlu0 %v897_v25, %s2736_s22 }
  0x39   : > { %981 = vrot.lane.b32.xlu1 %v976_v27, %s2735_s21  ;;  %979 = vrot.lane.b32.xlu0 %v972_v28, %s2735_s21 }
  0x3d   : > { %1056 = vrot.lane.b32.xlu1 %v1051_v30, %s4568_s23  ;;  %1054 = vrot.lane.b32.xlu0 %v1047_v31, %s4568_s23 }
  0x41   : > { %1206 = vrot.lane.b32.xlu0 %v1199_v34, %s2736_s22  ;;  %1208 = vrot.lane.b32.xlu1 %v1203_v35, %s2736_s22 }
  0x45   : > { %1281 = vrot.lane.b32.xlu0 %v1274_v36, %s2735_s21  ;;  %1283 = vrot.lane.b32.xlu1 %v1278_v37, %s2735_s21 }
  0x49   : > { %1356 = vrot.lane.b32.xlu0 %v1349_v38, %s4568_s23  ;;  %1358 = vrot.lane.b32.xlu1 %v1353_v39, %s4568_s23  ;;  %v3024_v39 = vld [vmem:[%s2951_s26 + $0x30] sm:$0xf] }
  0x4d   : > { %1508 = vrot.lane.b32.xlu0 %v1501_v40, %s2736_s22  ;;  %1510 = vrot.lane.b32.xlu1 %v1505_v41, %s2736_s22 }
  0x51   : > { %1583 = vrot.lane.b32.xlu0 %v1576_v42, %s2735_s21  ;;  %1585 = vrot.lane.b32.xlu1 %v1580_v43, %s2735_s21 }
  0x55   : > { %1658 = vrot.lane.b32.xlu0 %v1651_v44, %s4568_s23  ;;  %1660 = vrot.lane.b32.xlu1 %v1655_v45, %s4568_s23 }
  0x8f   : > { %v439_v47 = vpop.permute.xlu1 %438  ;;  %v383_v48 = vpop.permute.xlu0 %382 }
  0x90   : > { %v391_v49 = vmul.f32 %v383_v48, %v2954_v46  ;;  %v447_v56 = vmul.f32 %v439_v47, %v2954_v46  ;;  %v394_v57 = vmul.f32 %v383_v48, %v2964_v55  ;;  %v450_v61 = vmul.f32 %v439_v47, %v2964_v55 }
  0x92   : > { %403 = vrot.lane.b32.xlu0 %v391_v49, %s4568_s23 }
  0x93   : > { %v441_v51 = vpop.permute.xlu1 %440  ;;  %v385_v52 = vpop.permute.xlu0 %384 }
  0x94   : > { %v393_v53 = vmul.f32 %v385_v52, %v2958_v50  ;;  %v449_v54 = vmul.f32 %v441_v51, %v2958_v50  ;;  %v396_v60 = vmul.f32 %v385_v52, %v2971_v58  ;;  %v387_v6 = vsel %vm386_vm0, %v383_v48, %v385_v52 }
  0x95   : > { %v392_v8 = vmul.f32 %v387_v6, %v2982_v0  ;;  %v452_v14 = vmul.f32 %v441_v51, %v2971_v58  ;;  %v395_v15 = vmul.f32 %v387_v6, %v2990_v9  ;;  %v443_v24 = vsel %vm442_vm2, %v439_v47, %v441_v51  ;;  %v3036_v47 = vld [vmem:[%s2951_s26 + $0x40] sm:$0xf] }
  0x96   : > { %407 = vrot.lane.b32.xlu1 %v393_v53, %s4568_s23  ;;  %463 = vrot.lane.b32.xlu0 %v449_v54, %s2735_s21  ;;  %v448_v33 = vmul.f32 %v443_v24, %v2982_v0  ;;  %v451_v34 = vmul.f32 %v443_v24, %v2990_v9 }
  0x97   : > { %v496_v59 = vpop.permute.xlu1 %495  ;;  %v494_v2 = vpop.permute.xlu0 %493 }
  0x98   : > { %v503_v62 = vmul.f32 %v496_v59, %v2958_v50  ;;  %v506_v63 = vmul.f32 %v496_v59, %v2971_v58  ;;  %v501_v7 = vmul.f32 %v494_v2, %v2954_v46  ;;  %v497_v17 = vsel %vm415_vm1, %v494_v2, %v496_v59 }
  0x99   : > { %v504_v21 = vmul.f32 %v494_v2, %v2964_v55  ;;  %v502_v22 = vmul.f32 %v497_v17, %v2982_v0  ;;  %v505_v44 = vmul.f32 %v497_v17, %v2990_v9 }
  0x9a   : > { %459 = vrot.lane.b32.xlu1 %v447_v56, %s2735_s21  ;;  %409 = vrot.lane.b32.xlu0 %v394_v57, %s4568_s23 }
  0x9b   : > { %v605_v11 = vpop.permute.xlu1 %604  ;;  %v603_v12 = vpop.permute.xlu0 %602 }
  0x9c   : > { %v610_v18 = vmul.f32 %v603_v12, %v2954_v46  ;;  %v613_v20 = vmul.f32 %v603_v12, %v2964_v55  ;;  %v612_v28 = vmul.f32 %v605_v11, %v2958_v50  ;;  %v615_v30 = vmul.f32 %v605_v11, %v2971_v58 }
  0x9d   : > { %v616_v45 = vmul.f32 %v603_v12, %v3024_v39  ;;  %v618_v56 = vmul.f32 %v605_v11, %v3036_v47 }
  0x9e   : > { %413 = vrot.lane.b32.xlu1 %v396_v60, %s4568_s23  ;;  %465 = vrot.lane.b32.xlu0 %v450_v61, %s2735_s21  ;;  %v628_v25 = vrot.slane %v610_v18, 1  ;;  %v629_v27 = vrot.slane %v613_v20, 1  ;;  %v634_v37 = vrot.slane %v612_v28, 1  ;;  %v635_v38 = vrot.slane %v615_v30, 1 }
  0x9f   : > { %v3003_v23 = vpop.permute.xlu1 %679  ;;  %v3018_v35 = vpop.permute.xlu0 %677  ;;  %v637_v54 = vrot.slane %v616_v45, 1  ;;  %v641_v6 = vrot.slane %v618_v56, 1 }
  0xa0   : > { %v687_v31 = vmul.f32 %v3003_v23, %v2958_v50  ;;  %v3014_v32 = vmul.f32 %v3003_v23, %v2971_v58  ;;  %v630_v36 = vsel %vm573_vm3, %v628_v25, %v629_v27  ;;  %v685_v42 = vmul.f32 %v3018_v35, %v2954_v46 }
  0xa1   : > { %v688_v43 = vmul.f32 %v3018_v35, %v2964_v55  ;;  %v636_v48 = vsel %vm573_vm3, %v634_v37, %v635_v38  ;;  %v691_v57 = vmul.f32 %v3018_v35, %v3024_v39 }
  0xa2   : > { %517 = vrot.lane.b32.xlu1 %v503_v62, %s2736_s22  ;;  %523 = vrot.lane.b32.xlu0 %v506_v63, %s2736_s22  ;;  %v709_v40 = vrot.slane %v687_v31, 1  ;;  %v710_v41 = vrot.slane %v3014_v32, 1  ;;  %v703_v51 = vrot.slane %v685_v42, 1  ;;  %v638_v63 = vsel %vm573_vm3, %v629_v27, %v637_v54 }
  0xa3   : > { %v704_v52 = vrot.slane %v688_v43, 1  ;;  %v755_v53 = vpop.permute.xlu1 %754  ;;  %v753_v2 = vpop.permute.xlu0 %752 }
  0xa4   : > { %v711_v49 = vsel %vm573_vm3, %v709_v40, %v710_v41  ;;  %v762_v60 = vmul.f32 %v755_v53, %v2958_v50  ;;  %v765_v61 = vmul.f32 %v755_v53, %v2971_v58  ;;  %v768_v62 = vmul.f32 %v755_v53, %v3036_v47 }
  0xa5   : > { %v705_v59 = vsel %vm573_vm3, %v703_v51, %v704_v52  ;;  %v763_v20 = vmul.f32 %v753_v2, %v2964_v55  ;;  %v766_v42 = vmul.f32 %v753_v2, %v3024_v39 }
  0xa6   : > { %513 = vrot.lane.b32.xlu1 %v501_v7, %s2736_s22  ;;  %405 = vrot.lane.b32.xlu0 %v392_v8, %s4568_s23  ;;  %v712_v7 = vrot.slane %v691_v57, 1  ;;  %v606_v8 = vsel %vm386_vm0, %v603_v12, %v605_v11  ;;  %v785_v17 = vrot.slane %v765_v61, 1  ;;  %v791_v18 = vrot.slane %v768_v62, 1  ;;  %v3066_v12 = vld [vmem:[%s2951_s26 + $0x38] sm:$0xf] }
  0xa7   : > { %v611_v24 = vmul.f32 %v606_v8, %v2982_v0  ;;  %v614_v25 = vmul.f32 %v606_v8, %v2990_v9  ;;  %v693_v11 = vmul.f32 %v3003_v23, %v3036_v47  ;;  %v779_v31 = vrot.slane %v763_v20, 1  ;;  %v3081_v51 = vpop.permute.xlu0 %904 }
  0xa8   : > { %v792_v28 = vsel %vm573_vm3, %v785_v17, %v791_v18  ;;  %v617_v37 = vmul.f32 %v606_v8, %v3066_v12  ;;  %v787_v54 = vrot.slane %v766_v42, 1 }
  0xa9   : > { %v716_v40 = vrot.slane %v693_v11, 1 }
  0xaa   : > { %469 = vrot.lane.b32.xlu1 %v452_v14, %s2735_s21  ;;  %411 = vrot.lane.b32.xlu0 %v395_v15, %s4568_s23  ;;  %v760_v14 = vmul.f32 %v753_v2, %v2954_v46  ;;  %v784_v15 = vrot.slane %v762_v60, 1  ;;  %v788_v62 = vsel %vm573_vm3, %v779_v31, %v787_v54 }
  0xac   : > { %v786_v27 = vsel %vm573_vm3, %v784_v15, %v785_v17  ;;  %v778_v30 = vrot.slane %v760_v14, 1 }
  0xae   : > { %519 = vrot.lane.b32.xlu1 %v504_v21, %s2736_s22  ;;  %515 = vrot.lane.b32.xlu0 %v502_v22, %s2736_s22  ;;  %v642_v21 = vsel %vm573_vm3, %v635_v38, %v641_v6  ;;  %v713_v22 = vsel %vm573_vm3, %v704_v52, %v712_v7  ;;  %v780_v38 = vsel %vm573_vm3, %v778_v30, %v779_v31  ;;  %v3108_v6 = vpop.permute.xlu0 %979 }
  0xaf   : > { %v681_v52 = vsel %vm442_vm2, %v3018_v35, %v3003_v23 }
  0xb0   : > { %v686_v61 = vmul.f32 %v681_v52, %v2982_v0  ;;  %v689_v23 = vmul.f32 %v681_v52, %v2990_v9  ;;  %v692_v35 = vmul.f32 %v681_v52, %v3066_v12 }
  0xb2   : > { %461 = vrot.lane.b32.xlu1 %v448_v33, %s2735_s21  ;;  %467 = vrot.lane.b32.xlu0 %v451_v34, %s2735_s21  ;;  %v756_v33 = vsel %vm415_vm1, %v753_v2, %v755_v53  ;;  %v631_v34 = vrot.slane %v611_v24, 1  ;;  %v717_v53 = vsel %vm573_vm3, %v710_v41, %v716_v40  ;;  %v706_v8 = vrot.slane %v686_v61, 1 }
  0xb3   : > { %v761_v43 = vmul.f32 %v756_v33, %v2982_v0  ;;  %v707_v14 = vrot.slane %v689_v23, 1  ;;  %v714_v15 = vrot.slane %v692_v35, 1  ;;  %v987_v61 = vmul.f32 %v3108_v6, %v2954_v46 }
  0xb4   : > { %v3162_v23 = vmul.f32 %v3108_v6, %v2964_v55 }
  0xb5   : > { %v781_v56 = vrot.slane %v761_v43, 1  ;;  %v715_v11 = vsel %vm573_vm3, %v707_v14, %v714_v15 }
  0xb6   : > { %521 = vrot.lane.b32.xlu1 %v505_v44, %s2736_s22  ;;  %643 = vrot.lane.b32.xlu0 %v630_v36, %s4568_s23  ;;  %v632_v36 = vrot.slane %v614_v25, 1  ;;  %v764_v44 = vmul.f32 %v756_v33, %v2990_v9  ;;  %v708_v25 = vsel %vm573_vm3, %v706_v8, %v707_v14  ;;  %v1005_v8 = vrot.slane %v987_v61, 2 }
  0xb8   : > { %v633_v45 = vsel %vm573_vm3, %v631_v34, %v632_v36  ;;  %v782_v57 = vrot.slane %v764_v44, 1 }
  0xba   : > { %647 = vrot.lane.b32.xlu1 %v636_v48, %s4568_s23  ;;  %722 = vrot.lane.b32.xlu0 %v711_v49, %s2735_s21  ;;  %v639_v48 = vrot.slane %v617_v37, 1  ;;  %v3079_v49 = vpop.permute.xlu1 %906  ;;  %v783_v7 = vsel %vm573_vm3, %v781_v56, %v782_v57 }
  0xbb   : > { %v917_v24 = vmul.f32 %v3079_v49, %v2971_v58  ;;  %v920_v15 = vmul.f32 %v3079_v49, %v3036_v47 }
  0xbc   : > { %v640_v60 = vsel %vm573_vm3, %v632_v36, %v639_v48 }
  0xbe   : > { %718 = vrot.lane.b32.xlu1 %v705_v59, %s2735_s21  ;;  %649 = vrot.lane.b32.xlu0 %v638_v63, %s4568_s23  ;;  %v908_v59 = vsel %vm386_vm0, %v3081_v51, %v3079_v49  ;;  %v767_v63 = vmul.f32 %v756_v33, %v3066_v12  ;;  %v3106_v2 = vpop.permute.xlu1 %981 }
  0xbf   : > { %v913_v32 = vmul.f32 %v908_v59, %v2982_v0  ;;  %v3102_v41 = vmul.f32 %v908_v59, %v2990_v9  ;;  %v3117_v20 = vsel %vm442_vm2, %v3108_v6, %v3106_v2  ;;  %v989_v34 = vmul.f32 %v3106_v2, %v2958_v50 }
  0xc0   : > { %v988_v30 = vmul.f32 %v3117_v20, %v2982_v0  ;;  %v3138_v33 = vmul.f32 %v3117_v20, %v2990_v9  ;;  %v3144_v36 = vmul.f32 %v3106_v2, %v2971_v58  ;;  %v919_v35 = vmul.f32 %v908_v59, %v3066_v12 }
  0xc1   : > { %v933_v17 = vrot.slane %v913_v32, 2  ;;  %v934_v18 = vrot.slane %v3102_v41, 2  ;;  %v1006_v59 = vrot.slane %v3162_v23, 2 }
  0xc2   : > { %653 = vrot.lane.b32.xlu1 %v642_v21, %s4568_s23  ;;  %724 = vrot.lane.b32.xlu0 %v713_v22, %s2735_s21  ;;  %v789_v21 = vrot.slane %v767_v63, 1  ;;  %v914_v22 = vmul.f32 %v3079_v49, %v2958_v50  ;;  %v1057_v44 = vpop.permute.xlu1 %1056  ;;  %v1008_v48 = vrot.slane %v988_v30, 2  ;;  %v1009_v52 = vrot.slane %v3138_v33, 2 }
  0xc3   : > { %v935_v31 = vsel %vm875_vm4, %v933_v17, %v934_v18  ;;  %v1012_v54 = vrot.slane %v3144_v36, 2  ;;  %v941_v14 = vrot.slane %v919_v35, 2 }
  0xc4   : > { %v936_v37 = vrot.slane %v914_v22, 2  ;;  %v790_v40 = vsel %vm573_vm3, %v782_v57, %v789_v21  ;;  %v1010_v32 = vsel %vm875_vm4, %v1008_v48, %v1009_v52  ;;  %v1064_v22 = vmul.f32 %v1057_v44, %v2958_v50 }
  0xc5   : > { %v942_v49 = vsel %vm875_vm4, %v934_v18, %v941_v14 }
  0xc6   : > { %797 = vrot.lane.b32.xlu1 %v786_v27, %s2736_s22  ;;  %803 = vrot.lane.b32.xlu0 %v792_v28, %s2736_s22  ;;  %v912_v27 = vmul.f32 %v3081_v51, %v2954_v46  ;;  %v3129_v28 = vmul.f32 %v3081_v51, %v2964_v55  ;;  %v1086_v33 = vrot.slane %v1064_v22, 2 }
  0xc8   : > { %v930_v42 = vrot.slane %v912_v27, 2  ;;  %v931_v43 = vrot.slane %v3129_v28, 2  ;;  %v1007_v27 = vsel %vm875_vm4, %v1005_v8, %v1006_v59  ;;  %v943_v28 = vrot.slane %v920_v15, 2 }
  0xca   : > { %793 = vrot.lane.b32.xlu1 %v780_v38, %s2736_s22  ;;  %645 = vrot.lane.b32.xlu0 %v633_v45, %s4568_s23  ;;  %v937_v38 = vrot.slane %v917_v24, 2  ;;  %v3148_v45 = vpop.permute.xlu0 %1054  ;;  %v1067_v24 = vmul.f32 %v1057_v44, %v2971_v58 }
  0xcb   : > { %v1058_v57 = vsel %vm415_vm1, %v3148_v45, %v1057_v44  ;;  %v1065_v18 = vmul.f32 %v3148_v45, %v2964_v55 }
  0xcc   : > { %v938_v56 = vsel %vm875_vm4, %v936_v37, %v937_v38  ;;  %v3173_v63 = vmul.f32 %v1058_v57, %v2990_v9 }
  0xcd   : > { %v1081_v23 = vrot.slane %v1065_v18, 2 }
  0xce   : > { %728 = vrot.lane.b32.xlu1 %v717_v53, %s2735_s21  ;;  %651 = vrot.lane.b32.xlu0 %v640_v60, %s4568_s23  ;;  %v1011_v53 = vrot.slane %v989_v34, 2  ;;  %v932_v60 = vsel %vm875_vm4, %v930_v42, %v931_v43  ;;  %v1084_v21 = vrot.slane %v3173_v63, 2  ;;  %v1087_v34 = vrot.slane %v1067_v24, 2 }
  0xcf   : > { %v994_v42 = vmul.f32 %v3117_v20, %v3066_v12  ;;  %v993_v20 = vmul.f32 %v3108_v6, %v3024_v39 }
  0xd0   : > { %v1013_v41 = vsel %vm875_vm4, %v1011_v53, %v1012_v54  ;;  %v1088_v53 = vsel %vm875_vm4, %v1086_v33, %v1087_v34 }
  0xd1   : > { %v1016_v35 = vrot.slane %v994_v42, 2  ;;  %v1014_v8 = vrot.slane %v993_v20, 2  ;;  %v1766_v42 = vld [vmem:[%s4539_s4 + $0x28] sm:$0xff] }
  0xd2   : > { %799 = vrot.lane.b32.xlu1 %v788_v62, %s2736_s22  ;;  %795 = vrot.lane.b32.xlu0 %v783_v7, %s2736_s22  ;;  %v1063_v62 = vmul.f32 %v1058_v57, %v2982_v0  ;;  %v3175_v7 = vpop.permute.xlu0 %1206 }
  0xd4   : > { %v1083_v17 = vrot.slane %v1063_v62, 2 }
  0xd6   : > { %720 = vrot.lane.b32.xlu1 %v708_v25, %s2735_s21  ;;  %726 = vrot.lane.b32.xlu0 %v715_v11, %s2735_s21  ;;  %v918_v25 = vmul.f32 %v3081_v51, %v3024_v39  ;;  %v3187_v11 = vpop.permute.xlu1 %1208  ;;  %v3193_v30 = vpop.permute.xlu0 %1281  ;;  %v944_v51 = vsel %vm875_vm4, %v937_v38, %v943_v28 }
  0xd7   : > { %v3226_v6 = vsel %vm386_vm0, %v3175_v7, %v3187_v11  ;;  %v1216_v36 = vmul.f32 %v3187_v11, %v2958_v50  ;;  %v3267_v33 = vmul.f32 %v3187_v11, %v2971_v58 }
  0xd8   : > { %v939_v37 = vrot.slane %v918_v25, 2  ;;  %v1215_v22 = vmul.f32 %v3226_v6, %v2982_v0  ;;  %v3242_v24 = vmul.f32 %v3226_v6, %v2990_v9 }
  0xd9   : > { %v1238_v20 = vrot.slane %v1216_v36, 3 }
  0xda   : > { %801 = vrot.lane.b32.xlu1 %v790_v40, %s2736_s22  ;;  %947 = vrot.lane.b32.xlu0 %v935_v31, %s4568_s23  ;;  %v1085_v31 = vsel %vm875_vm4, %v1083_v17, %v1084_v21  ;;  %v1062_v40 = vmul.f32 %v3148_v45, %v2954_v46  ;;  %v3205_v48 = vpop.permute.xlu1 %1283  ;;  %v3209_v38 = vpop.permute.xlu0 %1356  ;;  %v1015_v17 = vsel %vm875_vm4, %v1006_v59, %v1014_v8  ;;  %v1764_v59 = vld [vmem:[%s4539_s4 + $0x18] sm:$0xff]  ;;  %v1236_v18 = vrot.slane %v3242_v24, 3  ;;  %v1783_v24 = vld [vmem:[%s4539_s4 + $0xb0] sm:$0xff] }
  0xdb   : > { %v3310_v8 = vmul.f32 %v3205_v48, %v2971_v58 }
  0xdc   : > { %v1080_v61 = vrot.slane %v1062_v40, 2  ;;  %v1235_v40 = vrot.slane %v1215_v22, 3 }
  0xde   : > { %949 = vrot.lane.b32.xlu1 %v938_v56, %s4568_s23  ;;  %945 = vrot.lane.b32.xlu0 %v932_v60, %s4568_s23  ;;  %v940_v56 = vsel %vm875_vm4, %v931_v43, %v939_v37  ;;  %v995_v60 = vmul.f32 %v3106_v2, %v3036_v47  ;;  %v1070_v43 = vmul.f32 %v1057_v44, %v3036_v47  ;;  %v3230_v14 = vpop.permute.xlu0 %1508  ;;  %v1761_v37 = vld [vmem:[%s4539_s4] sm:$0xff] }
  0xdf   : > { %v1082_v62 = vsel %vm875_vm4, %v1080_v61, %v1081_v23  ;;  %v1017_v2 = vsel %vm875_vm4, %v1009_v52, %v1016_v35  ;;  %v1068_v44 = vmul.f32 %v3148_v45, %v3024_v39  ;;  %v1765_v61 = vld [vmem:[%s4539_s4 + $0x20] sm:$0xff]  ;;  %v1767_v35 = vld [vmem:[%s4539_s4 + $0x30] sm:$0xff] }
  0xe0   : > { %v1018_v63 = vrot.slane %v995_v60, 2  ;;  %v1093_v15 = vrot.slane %v1070_v43, 2 }
  0xe1   : > { %v1089_v25 = vrot.slane %v1068_v44, 2 }
  0xe2   : > { %1022 = vrot.lane.b32.xlu1 %v1010_v32, %s2735_s21  ;;  %1024 = vrot.lane.b32.xlu0 %v1013_v41, %s2735_s21  ;;  %v3217_v32 = vpop.permute.xlu1 %1358  ;;  %v1069_v41 = vmul.f32 %v1058_v57, %v3066_v12  ;;  %v1019_v52 = vsel %vm875_vm4, %v1012_v54, %v1018_v63  ;;  %v1762_v54 = vld [vmem:[%s4539_s4 + $0x8] sm:$0xff]  ;;  %v1094_v28 = vsel %vm875_vm4, %v1087_v34, %v1093_v15  ;;  %v1772_v15 = vld [vmem:[%s4539_s4 + $0x58] sm:$0xff] }
  0xe3   : > { %v3280_v34 = vmul.f32 %v3175_v7, %v2964_v55  ;;  %v2482_v60 = vpack.c.bf16 %v1764_v59, %v1762_v54  ;;  %v1291_v63 = vmul.f32 %v3205_v48, %v2958_v50  ;;  %v1769_v54 = vld [vmem:[%s4539_s4 + $0x40] sm:$0xff]  ;;  %v1771_v59 = vld [vmem:[%s4539_s4 + $0x50] sm:$0xff] }
  0xe4   : > { %v1091_v57 = vrot.slane %v1069_v41, 2 }
  0xe5   : > { %2483 = vmatprep.subr.bf16.mxu0 %v2482_v60  ;;  %v4548_v22 = vrot.slane %v3280_v34, 3  ;;  %v1776_v60 = vld [vmem:[%s4539_s4 + $0x78] sm:$0xff] }
  0xe6   : > { %1020 = vrot.lane.b32.xlu1 %v1007_v27, %s2735_s21  ;;  %953 = vrot.lane.b32.xlu0 %v942_v49, %s4568_s23  ;;  %v3246_v45 = vpop.permute.xlu1 %1510  ;;  %v3259_v27 = vsel %vm442_vm2, %v3193_v30, %v3205_v48  ;;  %v1092_v49 = vsel %vm875_vm4, %v1084_v21, %v1091_v57  ;;  %v1214_v21 = vmul.f32 %v3175_v7, %v2954_v46  ;;  %v1770_v57 = vld [vmem:[%s4539_s4 + $0x48] sm:$0xff] }
  0xe7   : > { %v1290_v41 = vmul.f32 %v3259_v27, %v2982_v0  ;;  %v3301_v43 = vmul.f32 %v3259_v27, %v2990_v9 }
  0xea   : > { %955 = vrot.lane.b32.xlu1 %v944_v51, %s4568_s23  ;;  %1097 = vrot.lane.b32.xlu0 %v1085_v31, %s2736_s22  ;;  %v3263_v31 = vpop.permute.xlu0 %1583  ;;  %v1763_v51 = vld [vmem:[%s4539_s4 + $0x10] sm:$0xff] }
  0xee   : > { %1099 = vrot.lane.b32.xlu1 %v1088_v53, %s2736_s22  ;;  %951 = vrot.lane.b32.xlu0 %v940_v56, %s4568_s23  ;;  %v1768_v53 = vld [vmem:[%s4539_s4 + $0x38] sm:$0xff]  ;;  %v1090_v56 = vsel %vm875_vm4, %v1081_v23, %v1089_v25  ;;  %v3303_v23 = vpop.permute.xlu1 %1585  ;;  %v2488_v25 = vpack.c.bf16 %v1767_v35, %v1765_v61  ;;  %v3324_v36 = vpop.permute.xlu0 %1658  ;;  %v3355_v35 = vmul.f32 %v3193_v30, %v2964_v55 }
  0xef   : > { %v2486_v44 = vpack.c.bf16 %v1768_v53, %v1766_v42  ;;  %v4544_v42 = vrot.slane %v3310_v8, 3  ;;  %v1289_v53 = vmul.f32 %v3193_v30, %v2954_v46 }
  0xf0   : > { %v4583_v16 = vrot.slane %v3355_v35, 3 }
  0xf2   : > { %1095 = vrot.lane.b32.xlu1 %v1082_v62, %s2736_s22  ;;  %1028 = vrot.lane.b32.xlu0 %v1017_v2, %s2735_s21  ;;  %v2484_v62 = vpack.c.bf16 %v1763_v51, %v1761_v37  ;;  %v1239_v2 = vrot.slane %v3267_v33, 3  ;;  %v4546_v37 = vrot.slane %v3301_v43, 3  ;;  %v2490_v51 = vpack.c.bf16 %v1772_v15, %v1770_v57 }
  0xf4   : > { %2485 = vmatpush1.bf16.msra.mxu0 %v2484_v62  ;;  %v3361_v62 = vpop.permute.xlu1 %1660 }
  0xf5   : > { %2487 = vmatprep.subr.bf16.mxu0 %v2486_v44  ;;  %v1775_v44 = vld [vmem:[%s4539_s4 + $0x70] sm:$0xff] }
  0xf6   : > { %1030 = vrot.lane.b32.xlu1 %v1019_v52, %s2735_s21  ;;  %1026 = vrot.lane.b32.xlu0 %v1015_v17, %s2735_s21  ;;  %v1237_v52 = vsel %vm1177_vm5, %v1235_v40, %v1236_v18  ;;  %v1232_v17 = vrot.slane %v1214_v21, 3  ;;  %v1240_v40 = vsel %vm1177_vm5, %v1238_v20, %v1239_v2  ;;  %v1313_v21 = vrot.slane %v1291_v63, 3  ;;  %v1773_v63 = vld [vmem:[%s4539_s4 + $0x60] sm:$0xff] }
  0xf7   : > { %v1221_v20 = vmul.f32 %v3226_v6, %v3066_v12 }
  0xf8   : > { %v1234_v61 = vsel %vm1177_vm5, %v1232_v17, %v4548_v22  ;;  %2489 = vmatpush1.bf16.msra.mxu0 %v2488_v25  ;;  %v1307_v17 = vrot.slane %v1289_v53, 3  ;;  %v1222_v25 = vmul.f32 %v3187_v11, %v3036_v47  ;;  %v2496_v11 = vpack.c.bf16 %v1775_v44, %v1773_v63  ;;  %v1777_v53 = vld [vmem:[%s4539_s4 + $0x80] sm:$0xff] }
  0xf9   : > { %2491 = vmatprep.subr.bf16.mxu0 %v2490_v51  ;;  %v4545_v51 = vrot.slane %v3355_v35, 3 }
  0xfa   : > { %1103 = vrot.lane.b32.xlu1 %v1092_v49, %s2736_s22  ;;  %1105 = vrot.lane.b32.xlu0 %v1094_v28, %s2736_s22  ;;  %v3335_v49 = vsel %vm415_vm1, %v3209_v38, %v3217_v32  ;;  %v1310_v28 = vrot.slane %v1290_v41, 3  ;;  %v2492_v41 = vpack.c.bf16 %v1771_v59, %v1769_v54  ;;  %v1778_v59 = vld [vmem:[%s4539_s4 + $0x88] sm:$0xff]  ;;  %v1245_v63 = vrot.slane %v1222_v25, 3 }
  0xfb   : > { %v1365_v54 = vmul.f32 %v3335_v49, %v2982_v0  ;;  %v1309_v25 = vsel %vm1177_vm5, %v1307_v17, %v4545_v51  ;;  %v1781_v17 = vld [vmem:[%s4539_s4 + $0xa0] sm:$0xff]  ;;  %v3454_v51 = vmul.f32 %v3209_v38, %v2964_v55 }
  0xfc   : > { %v1312_v6 = vsel %vm1177_vm5, %v1310_v28, %v4546_v37  ;;  %v1780_v28 = vld [vmem:[%s4539_s4 + $0x98] sm:$0xff]  ;;  %2493 = vmatpush1.bf16.msra.mxu0 %v2492_v41 }
  0xfd   : > { %v1385_v44 = vrot.slane %v1365_v54, 3 }
  0xfe   : > { %1101 = vrot.lane.b32.xlu1 %v1090_v56, %s2736_s22  ;;  %1249 = vrot.lane.b32.xlu0 %v1237_v52, %s4568_s23  ;;  %v1774_v56 = vld [vmem:[%s4539_s4 + $0x68] sm:$0xff]  ;;  %v1315_v52 = vsel %vm1177_vm5, %v1313_v21, %v4544_v42  ;;  %v3390_v21 = vmul.f32 %v3335_v49, %v2990_v9 }
  0xff   : > { %v2494_v57 = vpack.c.bf16 %v1776_v60, %v1774_v56  ;;  %v1779_v56 = vld [vmem:[%s4539_s4 + $0x90] sm:$0xff]  ;;  %v1366_v60 = vmul.f32 %v3217_v32, %v2958_v50  ;;  %v1782_v42 = vld [vmem:[%s4539_s4 + $0xa8] sm:$0xff] }
 0x101   : > { %2495 = vmatprep.subr.bf16.mxu0 %v2494_v57  ;;  %v1784_v57 = vld [vmem:[%s4539_s4 + $0xb8] sm:$0xff] }
 0x102   : > { %1251 = vrot.lane.b32.xlu1 %v1240_v40, %s4568_s23  ;;  %1247 = vrot.lane.b32.xlu0 %v1234_v61, %s4568_s23  ;;  %v1243_v40 = vrot.slane %v1221_v20, 3  ;;  %v2498_v61 = vpack.c.bf16 %v1780_v28, %v1778_v59  ;;  %v4547_v59 = vrot.slane %v3390_v21, 3  ;;  %v3429_v28 = vrot.slane %v2847_v5, %v2883_v19 }
 0x103   : > { %2497 = vmatpush1.bf16.msra.mxu0 %v2496_v11  ;;  %v359_v11 = vrot.slane %v2838_v1, %v2883_v19  ;;  %v1786_v1 = vld [vmem:[%s4539_s4 + $0xc8] sm:$0xff] }
 0x104   : > { %v3372_v15 = vpop.permute.xlu0 %403  ;;  %v1244_v54 = vsel %vm1177_vm5, %v1236_v18, %v1243_v40  ;;  %v1388_v18 = vrot.slane %v1366_v60, 3  ;;  %v342_v40 = vld [vmem:[%s4538_s3] sm:$0x3]  ;;  %2499 = vmatprep.subr.bf16.mxu0 %v2498_v61  ;;  %v1364_v60 = vmul.f32 %v3209_v38, %v2954_v46  ;;  %v1387_v33 = vsel %vm1177_vm5, %v1385_v44, %v4547_v59 }
 0x105   : > { %v1296_v61 = vmul.f32 %v3259_v27, %v3066_v12  ;;  %v365_v37 = vmul.f32 %v3429_v28, %v2982_v0  ;;  %v1785_v44 = vld [vmem:[%s4539_s4 + $0xc0] sm:$0xff]  ;;  %v1787_v27 = vld [vmem:[%s4539_s4 + $0xd0] sm:$0xff]  ;;  %v367_v3 = vmul.f32 %v3429_v28, %v2990_v9 }
 0x106   : > { %1324 = vrot.lane.b32.xlu1 %v1312_v6, %s2735_s21  ;;  %1326 = vrot.lane.b32.xlu0 %v1315_v52, %s2735_s21  ;;  %v3408_v6 = vmul.f32 %v3217_v32, %v2971_v58  ;;  %v1220_v52 = vmul.f32 %v3175_v7, %v3024_v39  ;;  %v2500_v7 = vpack.c.bf16 %v1779_v56, %v1777_v53  ;;  %v1382_v59 = vrot.slane %v1364_v60, 3 }
 0x107   : > { %v2502_v53 = vpack.c.bf16 %v1784_v57, %v1782_v42  ;;  %v1788_v42 = vld [vmem:[%s4539_s4 + $0xd8] sm:$0xff]  ;;  %v3470_v57 = vrot.slane %v342_v40, %v2842_v4  ;;  %v1318_v22 = vrot.slane %v1296_v61, 3 }
 0x108   : > { %v3402_v20 = vpop.permute.xlu1 %407  ;;  %v3404_v41 = vpop.permute.xlu0 %463  ;;  %2501 = vmatpush1.bf16.msra.mxu0 %v2500_v7  ;;  %v364_v7 = vmul.f32 %v359_v11, %v2954_v46 }
 0x109   : > { %2503 = vmatprep.subr.bf16.mxu0 %v2502_v53  ;;  %v4578_v53 = vrot.slane %v3408_v6, 3  ;;  %v3513_v10 = vadd.f32 %v365_v37, %v3470_v57 }
 0x10a   : > { %1322 = vrot.lane.b32.xlu1 %v1309_v25, %s2735_s21  ;;  %1255 = vrot.lane.b32.xlu0 %v1244_v54, %s4568_s23  ;;  %v1246_v25 = vsel %vm1177_vm5, %v1239_v2, %v1245_v63  ;;  %v1241_v2 = vrot.slane %v1220_v52, 3  ;;  %v2504_v63 = vpack.c.bf16 %v1783_v24, %v1781_v17  ;;  %v3481_v52 = vrot.slane %v342_v40, %v2883_v19  ;;  %v1790_v40 = vld [vmem:[%s4539_s4 + $0xe8] sm:$0xff] }
 0x10b   : > { %v1297_v17 = vmul.f32 %v3205_v48, %v3036_v47  ;;  %v2506_v24 = vpack.c.bf16 %v1788_v42, %v1786_v1  ;;  %v1295_v54 = vmul.f32 %v3193_v30, %v3024_v39  ;;  %v1792_v48 = vld [vmem:[%s4539_s4 + $0xf8] sm:$0xff]  ;;  %v1390_v1 = vsel %vm1177_vm5, %v1388_v18, %v4578_v53  ;;  %v1791_v18 = vld [vmem:[%s4539_s4 + $0xf0] sm:$0xff] }
 0x10c   : > { %v3442_v5 = vpop.permute.xlu1 %459  ;;  %v3444_v56 = vpop.permute.xlu0 %409  ;;  %v4579_v42 = vrot.slane %v3280_v34, 3  ;;  %2505 = vmatpush1.bf16.msra.mxu0 %v2504_v63  ;;  %v2508_v19 = vpack.c.bf16 %v1787_v27, %v1785_v44  ;;  %v3508_v30 = vsel %vm386_vm0, %v3230_v14, %v3246_v45  ;;  %v1789_v34 = vld [vmem:[%s4539_s4 + $0xe0] sm:$0xff]  ;;  %v366_v63 = vmul.f32 %v359_v11, %v2964_v55  ;;  %v1794_v11 = vld [vmem:[%s4539_s4 + $0x108] sm:$0xff] }
 0x10d   : > { %v1320_v61 = vrot.slane %v1297_v17, 3  ;;  %2507 = vmatprep.subr.bf16.mxu0 %v2506_v24  ;;  %v2510_v44 = vpack.c.bf16 %v1792_v48, %v1790_v40  ;;  %v4580_v53 = vrot.slane %v3454_v51, 3  ;;  %v1796_v17 = vld [vmem:[%s4539_s4 + $0x118] sm:$0xff]  ;;  %v4581_v24 = vrot.slane %v3301_v43, 3 }
 0x10e   : > { %1257 = vrot.lane.b32.xlu1 %v1246_v25, %s4568_s23  ;;  %1399 = vrot.lane.b32.xlu0 %v1387_v33, %s2736_s22  ;;  %v1242_v60 = vsel %vm1177_vm5, %v4579_v42, %v1241_v2  ;;  %v3522_v2 = vadd.f32 %v364_v7, %v3481_v52  ;;  %v1316_v42 = vrot.slane %v1295_v54, 3  ;;  %v1372_v7 = vmul.f32 %v3217_v32, %v3036_v47 }
 0x10f   : > { %v1319_v40 = vsel %vm1177_vm5, %v4581_v24, %v1318_v22  ;;  %v2512_v32 = vpack.c.bf16 %v1791_v18, %v1789_v34  ;;  %v3552_v54 = vsel %vm442_vm2, %v3263_v31, %v3303_v23  ;;  %v3558_v43 = vmul.f32 %v3508_v30, %v2990_v9 }
 0x110   : > { %v3486_v25 = vpop.permute.xlu1 %413  ;;  %v3488_v33 = vpop.permute.xlu0 %465  ;;  %2509 = vmatpush1.bf16.msra.mxu0 %v2508_v19  ;;  %v1793_v19 = vld [vmem:[%s4539_s4 + $0x100] sm:$0xff]  ;;  %v3570_v22 = vmul.f32 %v3246_v45, %v2971_v58  ;;  %v1516_v48 = vmul.f32 %v3230_v14, %v2954_v46  ;;  %v3576_v34 = vmul.f32 %v3230_v14, %v2964_v55  ;;  %v2514_v18 = vpack.c.bf16 %v1796_v17, %v1794_v11  ;;  %v1800_v11 = vld [vmem:[%s4539_s4 + $0x138] sm:$0xff] }
 0x111   : > { %2511 = vmatprep.subr.bf16.mxu0 %v2510_v44  ;;  %v4582_v24 = vrot.slane %v3310_v8, 3  ;;  %v1317_v13 = vsel %vm1177_vm5, %v4583_v16, %v1316_v42  ;;  %v1798_v44 = vld [vmem:[%s4539_s4 + $0x128] sm:$0xff]  ;;  %v1395_v17 = vrot.slane %v1372_v7, 3  ;;  %v1538_v16 = vrot.slane %v3558_v43, 4  ;;  %v1799_v7 = vld [vmem:[%s4539_s4 + $0x130] sm:$0xff] }
 0x112   : > { %1401 = vrot.lane.b32.xlu1 %v1390_v1, %s2736_s22  ;;  %1253 = vrot.lane.b32.xlu0 %v1242_v60, %s4568_s23  ;;  %v1384_v1 = vsel %vm1177_vm5, %v1382_v59, %v4580_v53  ;;  %v1371_v60 = vmul.f32 %v3335_v49, %v3066_v12  ;;  %v1370_v59 = vmul.f32 %v3209_v38, %v3024_v39  ;;  %v1795_v38 = vld [vmem:[%s4539_s4 + $0x110] sm:$0xff] }
 0x113   : > { %v1517_v49 = vmul.f32 %v3508_v30, %v2982_v0  ;;  %v1518_v39 = vmul.f32 %v3246_v45, %v2958_v50  ;;  %v1592_v28 = vmul.f32 %v3552_v54, %v2982_v0  ;;  %v3601_v42 = vmul.f32 %v3552_v54, %v2990_v9 }
 0x114   : > { %v3525_v27 = vpop.permute.xlu1 %517  ;;  %v3527_v37 = vpop.permute.xlu0 %523  ;;  %v1393_v4 = vrot.slane %v1371_v60, 3  ;;  %v1391_v8 = vrot.slane %v1370_v59, 3  ;;  %2513 = vmatpush1.bf16.msra.mxu0 %v2512_v32  ;;  %v1797_v60 = vld [vmem:[%s4539_s4 + $0x120] sm:$0xff]  ;;  %v1534_v59 = vrot.slane %v1516_v48, 4  ;;  %v2518_v32 = vpack.c.bf16 %v1800_v11, %v1798_v44  ;;  %v1802_v48 = vld [vmem:[%s4539_s4 + $0x148] sm:$0xff] }
 0x115   : > { %v1537_v26 = vrot.slane %v1517_v49, 4  ;;  %v1540_v35 = vrot.slane %v1518_v39, 4  ;;  %v1535_v49 = vrot.slane %v3576_v34, 4  ;;  %2515 = vmatprep.subr.bf16.mxu0 %v2514_v18  ;;  %v3614_v0 = vsel %vm415_vm1, %v3324_v36, %v3361_v62  ;;  %v1804_v18 = vld [vmem:[%s4539_s4 + $0x158] sm:$0xff]  ;;  %v1801_v11 = vld [vmem:[%s4539_s4 + $0x140] sm:$0xff] }
 0x116   : > { %1397 = vrot.lane.b32.xlu1 %v1384_v1, %s2736_s22  ;;  %1330 = vrot.lane.b32.xlu0 %v1319_v40, %s2735_s21  ;;  %v1321_v40 = vsel %vm1177_vm5, %v4582_v24, %v1320_v61  ;;  %v2516_v61 = vpack.c.bf16 %v1795_v38, %v1793_v19  ;;  %v370_v39 = vadd.f32 %v366_v63, %v3481_v52  ;;  %v4585_v52 = vrot.slane %v3408_v6, 3 }
 0x117   : > { %v371_v19 = vadd.f32 %v367_v3, %v3470_v57  ;;  %v3622_v24 = vmul.f32 %v3303_v23, %v2958_v50  ;;  %v4586_v57 = vrot.slane %v3454_v51, 3  ;;  %v2520_v63 = vpack.c.bf16 %v1799_v7, %v1797_v60 }
 0x118   : > { %v3578_v53 = vpop.permute.xlu1 %513  ;;  %v406_v1 = vpop.permute.xlu0 %405  ;;  %v1396_v3 = vsel %vm1177_vm5, %v4585_v52, %v1395_v17  ;;  %2517 = vmatpush1.bf16.msra.mxu0 %v2516_v61  ;;  %v1612_v51 = vrot.slane %v1592_v28, 4  ;;  %v1613_v6 = vrot.slane %v3601_v42, 4  ;;  %v3653_v17 = vmul.f32 %v3303_v23, %v2971_v58 }
 0x119   : > { %v1392_v50 = vsel %vm1177_vm5, %v4586_v57, %v1391_v8  ;;  %v1536_v61 = vsel %vm1479_vm6, %v1534_v59, %v1535_v49  ;;  %v3663_v60 = vmul.f32 %v3263_v31, %v2954_v46  ;;  %2519 = vmatprep.subr.bf16.mxu0 %v2518_v32  ;;  %v416_v28 = vsel %vm415_vm1, %v3372_v15, %v406_v1  ;;  %v1806_v59 = vld [vmem:[%s4539_s4 + $0x168] sm:$0xff]  ;;  %v1808_v46 = vld [vmem:[%s4539_s4 + $0x178] sm:$0xff] }
 0x11a   : > { %1332 = vrot.lane.b32.xlu1 %v1321_v40, %s2735_s21  ;;  %1328 = vrot.lane.b32.xlu0 %v1317_v13, %s2735_s21  ;;  %v1541_v13 = vrot.slane %v3570_v22, 4  ;;  %v4584_v40 = vrot.slane %v3390_v21, 3  ;;  %v1803_v21 = vld [vmem:[%s4539_s4 + $0x150] sm:$0xff]  ;;  %v417_v58 = vsel %vm415_vm1, %v406_v1, %v3402_v20  ;;  %v3708_v52 = vmul.f32 %v3246_v45, %v3036_v47 }
 0x11b   : > { %v425_v57 = vadd.f32 %v417_v58, %v3513_v10  ;;  %v1814_v58 = vld [vmem:[%s4539_s4 + $0x1a8] sm:$0xff] }
 0x11c   : > { %v3616_v9 = vpop.permute.xlu1 %469  ;;  %v412_v38 = vpop.permute.xlu0 %411  ;;  %v1394_v44 = vsel %vm1177_vm5, %v4584_v40, %v1393_v4  ;;  %v1539_v4 = vsel %vm1479_vm6, %v1537_v26, %v1538_v16  ;;  %v1542_v8 = vsel %vm1479_vm6, %v1540_v35, %v1541_v13  ;;  %v2522_v26 = vpack.c.bf16 %v1804_v18, %v1802_v48  ;;  %2521 = vmatpush1.bf16.msra.mxu0 %v2520_v63  ;;  %v1807_v48 = vld [vmem:[%s4539_s4 + $0x170] sm:$0xff] }
 0x11d   : > { %v1615_v35 = vrot.slane %v3622_v24, 4  ;;  %v418_v32 = vsel %vm415_vm1, %v3444_v56, %v412_v38  ;;  %v419_v15 = vsel %vm415_vm1, %v412_v38, %v3486_v25  ;;  %v1805_v24 = vld [vmem:[%s4539_s4 + $0x160] sm:$0xff]  ;;  %v1614_v56 = vsel %vm1479_vm6, %v1612_v51, %v1613_v6 }
 0x11e   : > { %1405 = vrot.lane.b32.xlu1 %v1394_v44, %s2736_s22  ;;  %1407 = vrot.lane.b32.xlu0 %v1396_v3, %s2736_s22  ;;  %v2524_v44 = vpack.c.bf16 %v1803_v21, %v1801_v11  ;;  %v1616_v25 = vrot.slane %v3653_v17, 4  ;;  %v424_v38 = vadd.f32 %v416_v28, %v3522_v2  ;;  %v1609_v18 = vrot.slane %v3663_v60, 4  ;;  %v1812_v2 = vld [vmem:[%s4539_s4 + $0x198] sm:$0xff] }
 0x11f   : > { %2523 = vmatprep.subr.bf16.mxu0 %v2522_v26  ;;  %v2526_v3 = vpack.c.bf16 %v1808_v46, %v1806_v59  ;;  %v427_v63 = vadd.f32 %v419_v15, %v371_v19  ;;  %v2528_v21 = vpack.c.bf16 %v1807_v48, %v1805_v24  ;;  %v3736_v26 = vld [vmem:[%s2951_s26 + $0x8] sm:$0xff]  ;;  %v3758_v15 = vld [vmem:[%s2951_s26 + $0x20] sm:$0xff] }
 0x120   : > { %v520_v7 = vpop.permute.xlu1 %519  ;;  %v516_v40 = vpop.permute.xlu0 %515  ;;  %2525 = vmatpush1.bf16.msra.mxu0 %v2524_v44  ;;  %v3762_v24 = vmul.f32 %v3758_v15, %v3614_v0 }
 0x121   : > { %v525_v20 = vsel %vm386_vm0, %v3578_v53, %v516_v40  ;;  %v526_v1 = vsel %vm386_vm0, %v516_v40, %v3525_v27  ;;  %v3698_v27 = vmul.f32 %v3263_v31, %v2964_v55  ;;  %v3702_v53 = vmul.f32 %v3508_v30, %v3066_v12  ;;  %v1810_v30 = vld [vmem:[%s4539_s4 + $0x188] sm:$0xff]  ;;  %2527 = vmatprep.subr.bf16.mxu0 %v2526_v3 }
 0x122   : > { %1403 = vrot.lane.b32.xlu1 %v1392_v50, %s2736_s22  ;;  %1551 = vrot.lane.b32.xlu0 %v1539_v4, %s4568_s23  ;;  %v426_v50 = vadd.f32 %v418_v32, %v370_v39  ;;  %v2530_v28 = vpack.c.bf16 %v1812_v2, %v1810_v30  ;;  %v1617_v32 = vsel %vm1479_vm6, %v1615_v35, %v1616_v25 }
 0x124   : > { %v462_v55 = vpop.permute.xlu1 %461  ;;  %v468_v11 = vpop.permute.xlu0 %467  ;;  %2529 = vmatpush1.bf16.msra.mxu0 %v2528_v21 }
 0x125   : > { %v471_v47 = vsel %vm442_vm2, %v3442_v5, %v462_v55  ;;  %v472_v10 = vsel %vm442_vm2, %v462_v55, %v3404_v41  ;;  %v473_v45 = vsel %vm442_vm2, %v3488_v33, %v468_v11  ;;  %v474_v39 = vsel %vm442_vm2, %v468_v11, %v3616_v9  ;;  %v1809_v5 = vld [vmem:[%s4539_s4 + $0x180] sm:$0xff]  ;;  %v1811_v41 = vld [vmem:[%s4539_s4 + $0x190] sm:$0xff]  ;;  %2531 = vmatprep.subr.bf16.mxu0 %v2530_v28  ;;  %v1820_v55 = vld [vmem:[%s4539_s4 + $0x1d8] sm:$0xff] }
 0x126   : > { %v479_v19 = vadd.f32 %v471_v47, %v424_v38  ;;  %v480_v4 = vadd.f32 %v472_v10, %v425_v57  ;;  %v481_v51 = vadd.f32 %v473_v45, %v426_v50  ;;  %v482_v60 = vadd.f32 %v474_v39, %v427_v63  ;;  %1553 = vrot.lane.b32.xlu1 %v1542_v8, %s4568_s23  ;;  %v3778_v57 = vld [vmem:[%s2951_s26 + $0x28] sm:$0xff]  ;;  %v1813_v50 = vld [vmem:[%s4539_s4 + $0x1a0] sm:$0xff]  ;;  %v1815_v63 = vld [vmem:[%s4539_s4 + $0x1b0] sm:$0xff] }
 0x127   : > { %1549 = vrot.lane.b32.xlu0 %v1536_v61, %s4568_s23  ;;  %v1610_v33 = vrot.slane %v3698_v27, 4  ;;  %v1545_v9 = vrot.slane %v3702_v53, 4  ;;  %v3740_v8 = vmul.f32 %v3736_v26, %v3614_v0  ;;  %v1816_v61 = vld [vmem:[%s4539_s4 + $0x1b8] sm:$0xff]  ;;  %v2532_v38 = vpack.c.bf16 %v1811_v41, %v1809_v5  ;;  %v2660_v10 = vld [vmem:[%s4537_s2] sm:$0xff] }
 0x128   : > { %v3748_v40 = vadd.f32 %v525_v20, %v479_v19  ;;  %v3750_v44 = vadd.f32 %v526_v1, %v480_v4  ;;  %v522_v59 = vpop.permute.xlu1 %521  ;;  %v3752_v46 = vpop.permute.xlu0 %643  ;;  %v3768_v1 = vld [vmem:[%s2951_s26 + $0x10] sm:$0xff]  ;;  %v1547_v47 = vrot.slane %v3708_v52, 4  ;;  %v556_v45 = vrot.slane %v2660_v10, %v2905_v29  ;;  %v1817_v41 = vld [vmem:[%s4539_s4 + $0x1c0] sm:$0xff] }
 0x129   : > { %v527_v48 = vsel %vm386_vm0, %v520_v7, %v522_v59  ;;  %v528_v20 = vsel %vm386_vm0, %v522_v59, %v3527_v37  ;;  %v1668_v53 = vmul.f32 %v3768_v1, %v3361_v62  ;;  %v3782_v7 = vmul.f32 %v3778_v57, %v3361_v62  ;;  %2533 = vmatpush1.bf16.msra.mxu0 %v2532_v38  ;;  %v1824_v59 = vld [vmem:[%s4539_s4 + $0x1f8] sm:$0xff] }
 0x12a   : > { %v3772_v3 = vadd.f32 %v527_v48, %v481_v51  ;;  %v3774_v35 = vadd.f32 %v528_v20, %v482_v60  ;;  %1626 = vrot.lane.b32.xlu1 %v1614_v56, %s2735_s21  ;;  %v2534_v37 = vpack.c.bf16 %v1816_v61, %v1814_v58  ;;  %v1818_v56 = vld [vmem:[%s4539_s4 + $0x1c8] sm:$0xff]  ;;  %v1611_v30 = vsel %vm1479_vm6, %v1609_v18, %v1610_v33  ;;  %v3821_v51 = vld [vmem:[%s2951_s26 + $0x30] sm:$0xf]  ;;  %v3835_v58 = vld [vmem:[%s2951_s26] sm:$0xff] }
 0x12b   : > { %1628 = vrot.lane.b32.xlu0 %v1617_v32, %s2735_s21  ;;  %v1546_v2 = vsel %vm1479_vm6, %v1538_v16, %v1545_v9  ;;  %v1687_v39 = vrot.slane %v3740_v8, 4  ;;  %v4564_v19 = vrot.slane %v3762_v24, 4  ;;  %v2661_v18 = vld [vmem:[%s4537_s2 + $0x8] sm:$0xff]  ;;  %v2536_v16 = vpack.c.bf16 %v1815_v63, %v1813_v50  ;;  %v4587_v9 = vld [vmem:[#allocation11_spill] sm:$0xff] }
 0x12c   : > { %v3797_v11 = vpop.permute.xlu1 %647  ;;  %v3799_v21 = vpop.permute.xlu0 %722  ;;  %v560_v43 = vrot.slane %v2661_v18, %v2905_v29  ;;  %v1690_v52 = vrot.slane %v1668_v53, 4  ;;  %v4563_v4 = vrot.slane %v3782_v7, 4  ;;  %v1522_v60 = vmul.f32 %v3821_v51, %v3230_v14  ;;  %2535 = vmatprep.subr.bf16.mxu0 %v2534_v37  ;;  %v1819_v29 = vld [vmem:[%s4539_s4 + $0x1d0] sm:$0xff]  ;;  %v1822_v61 = vld [vmem:[%s4539_s4 + $0x1e8] sm:$0xff]  ;;  %v3853_v53 = vld [vmem:[%s2951_s26 + $0x18] sm:$0xff] }
 0x12d   : > { %v2538_v5 = vpack.c.bf16 %v1820_v55, %v1818_v56  ;;  %v540_v8 = vrot.slane %v2660_v10, %v4587_v9  ;;  %v544_v28 = vrot.slane %v2661_v18, %v4587_v9  ;;  %v1666_v14 = vmul.f32 %v3835_v58, %v3324_v36  ;;  %2537 = vmatpush1.bf16.msra.mxu0 %v2536_v16  ;;  %v1821_v10 = vld [vmem:[%s4539_s4 + $0x1e0] sm:$0xff] }
 0x12e   : > { %1624 = vrot.lane.b32.xlu1 %v1611_v30, %s2735_s21  ;;  %v1548_v20 = vsel %vm1479_vm6, %v1541_v13, %v1547_v47  ;;  %v3857_v38 = vmul.f32 %v3853_v53, %v3324_v36  ;;  %v561_v37 = vmul.f32 %v3835_v58, %v556_v45  ;;  %v563_v50 = vmul.f32 %v3853_v53, %v556_v45 }
 0x12f   : > { %1557 = vrot.lane.b32.xlu0 %v1546_v2, %s4568_s23  ;;  %v1689_v63 = vsel %vm1479_vm6, %v1687_v39, %v4564_v19  ;;  %v562_v56 = vmul.f32 %v3736_v26, %v560_v43  ;;  %v3866_v22 = vmul.f32 %v3758_v15, %v560_v43  ;;  %v2540_v13 = vpack.c.bf16 %v1819_v29, %v1817_v41  ;;  %v1823_v39 = vld [vmem:[%s4539_s4 + $0x1f0] sm:$0xff] }
 0x130   : > { %v3845_v32 = vpop.permute.xlu1 %718  ;;  %v3847_v48 = vpop.permute.xlu0 %649  ;;  %v1692_v55 = vsel %vm1479_vm6, %v1690_v52, %v4563_v4  ;;  %v1543_v30 = vrot.slane %v1522_v60, 4  ;;  %v1598_v2 = vmul.f32 %v3552_v54, %v3066_v12  ;;  %2539 = vmatprep.subr.bf16.mxu0 %v2538_v5  ;;  %v2542_v47 = vpack.c.bf16 %v1824_v59, %v1822_v61  ;;  %v3883_v52 = vld [vmem:[%s2951_s26 + $0x40] sm:$0xf] }
 0x131   : > { %v1684_v18 = vrot.slane %v1666_v14, 4  ;;  %v545_v16 = vmul.f32 %v3736_v26, %v540_v8  ;;  %v1599_v12 = vmul.f32 %v3883_v52, %v3303_v23  ;;  %v565_v54 = vmul.f32 %v3821_v51, %v556_v45  ;;  %2541 = vmatpush1.bf16.msra.mxu0 %v2540_v13 }
 0x132   : > { %1559 = vrot.lane.b32.xlu1 %v1548_v20, %s4568_s23  ;;  %v1685_v41 = vrot.slane %v3857_v38, 4  ;;  %v546_v29 = vmul.f32 %v3768_v1, %v544_v28  ;;  %v574_v61 = vrot.slane %v561_v37, 1  ;;  %v575_v59 = vrot.slane %v563_v50, 1  ;;  %2543 = vmatprep.subr.bf16.mxu0 %v2542_v47 }
 0x133   : > { %1701 = vrot.lane.b32.xlu0 %v1689_v63, %s2736_s22  ;;  %v577_v14 = vrot.slane %v562_v56, 1  ;;  %v578_v20 = vrot.slane %v3866_v22, 1  ;;  %v3896_v63 = vld [vmem:[%s2951_s26 + $0x38] sm:$0xf]  ;;  %v2544_v23 = vpack.c.bf16 %v1823_v39, %v1821_v10  ;;  %v1544_v45 = vsel %vm1479_vm6, %v1535_v49, %v1543_v30 }
 0x134   : > { %v3888_v60 = vpop.permute.xlu1 %653  ;;  %v3890_v5 = vpop.permute.xlu0 %724  ;;  %v566_v4 = vmul.f32 %v3896_v63, %v560_v43  ;;  %v1620_v19 = vrot.slane %v1598_v2, 4  ;;  %v1597_v37 = vmul.f32 %v3821_v51, %v3263_v31  ;;  %v547_v50 = vmul.f32 %v3758_v15, %v540_v8 }
 0x135   : > { %v1622_v56 = vrot.slane %v1599_v12, 4  ;;  %v580_v22 = vrot.slane %v565_v54, 1  ;;  %v548_v43 = vmul.f32 %v3778_v57, %v544_v28  ;;  %v1686_v34 = vsel %vm1479_vm6, %v1684_v18, %v1685_v41  ;;  %2545 = vmatpush1.bf16.msra.mxu0 %v2544_v23  ;;  %v4589_v23 = vld [vmem:[#allocation5_spill] sm:$0xff] }
 0x136   : > { %1703 = vrot.lane.b32.xlu1 %v1692_v55, %s2736_s22  ;;  %v550_v49 = vadd.f32 %v546_v29, %v3750_v44  ;;  %v549_v31 = vadd.f32 %v545_v16, %v3748_v40  ;;  %v576_v8 = vsel %vm573_vm3, %v574_v61, %v575_v59  ;;  %v579_v30 = vsel %vm573_vm3, %v577_v14, %v578_v20  ;;  %v3958_v61 = vld [vmem:[%s4537_s2 + $0x18] sm:$0xff] }
 0x137   : > { %1555 = vrot.lane.b32.xlu0 %v1544_v45, %s4568_s23  ;;  %v582_v2 = vrot.slane %v566_v4, 1  ;;  %v1673_v28 = vmul.f32 %v3896_v63, %v3614_v0  ;;  %v1621_v47 = vsel %vm1479_vm6, %v1613_v6, %v1620_v19  ;;  %v1618_v10 = vrot.slane %v1597_v37, 4 }
 0x138   : > { %v3908_v13 = vpop.permute.xlu1 %797  ;;  %v3910_v55 = vpop.permute.xlu0 %803  ;;  %v1674_v44 = vmul.f32 %v3883_v52, %v3361_v62  ;;  %v1623_v40 = vsel %vm1479_vm6, %v1616_v25, %v1622_v56  ;;  %v581_v4 = vsel %vm573_vm3, %v575_v59, %v580_v22  ;;  %v1672_v0 = vmul.f32 %v3821_v51, %v3324_v36 }
 0x139   : > { %v551_v39 = vadd.f32 %v547_v50, %v3772_v3  ;;  %v552_v42 = vadd.f32 %v548_v43, %v3774_v35  ;;  %v589_v19 = vadd.f32 %v579_v30, %v550_v49  ;;  %v588_v16 = vadd.f32 %v576_v8, %v549_v31  ;;  %v4588_v35 = vld [vmem:[#allocation6_spill] sm:$0xff] }
 0x13a   : > { %1699 = vrot.lane.b32.xlu1 %v1686_v34, %s2736_s22  ;;  %v583_v25 = vsel %vm573_vm3, %v578_v20, %v582_v2  ;;  %v1695_v12 = vrot.slane %v1673_v28, 4  ;;  %v1619_v36 = vsel %vm1479_vm6, %v1610_v33, %v1618_v10  ;;  %v1697_v3 = vrot.slane %v1674_v44, 4 }
 0x13b   : > { %1632 = vrot.lane.b32.xlu0 %v1621_v47, %s2735_s21  ;;  %v824_v27 = vrot.slane %v3958_v61, %v4588_v35  ;;  %v590_v59 = vadd.f32 %v581_v4, %v551_v39  ;;  %v591_v14 = vadd.f32 %v583_v25, %v552_v42  ;;  %v3964_v45 = vrot.slane %v3958_v61, %v4589_v23 }
 0x13c   : > { %v794_v6 = vpop.permute.xlu1 %793  ;;  %v646_v18 = vpop.permute.xlu0 %645  ;;  %v4590_v22 = vrot.slane %v3762_v24, 4  ;;  %v1693_v34 = vrot.slane %v1672_v0, 4  ;;  %v4591_v8 = vrot.slane %v3782_v7, 4 }
 0x13d   : > { %v655_v62 = vsel %vm415_vm1, %v3752_v46, %v646_v18  ;;  %v656_v17 = vsel %vm415_vm1, %v646_v18, %v3797_v11  ;;  %v3949_v46 = vld [vmem:[%s4537_s2 + $0x10] sm:$0xff]  ;;  %v826_v24 = vmul.f32 %v3768_v1, %v824_v27  ;;  %v864_v7 = vmul.f32 %v3736_v26, %v3964_v45 }
 0x13e   : > { %v663_v54 = vadd.f32 %v655_v62, %v588_v16  ;;  %v664_v29 = vadd.f32 %v656_v17, %v589_v19  ;;  %1634 = vrot.lane.b32.xlu1 %v1623_v40, %s2735_s21  ;;  %v3953_v11 = vrot.slane %v3949_v46, %v4588_v35  ;;  %v3968_v37 = vrot.slane %v3949_v46, %v4589_v23 }
 0x13f   : > { %1630 = vrot.lane.b32.xlu0 %v1619_v36, %s2735_s21  ;;  %v1696_v43 = vsel %vm1479_vm6, %v4590_v22, %v1695_v12  ;;  %v1698_v30 = vsel %vm1479_vm6, %v4591_v8, %v1697_v3  ;;  %v3994_v10 = vmul.f32 %v3758_v15, %v3964_v45  ;;  %v1694_v39 = vsel %vm1479_vm6, %v1685_v41, %v1693_v34 }
 0x140   : > { %v729_v33 = vpop.permute.xlu1 %728  ;;  %v652_v20 = vpop.permute.xlu0 %651  ;;  %v825_v2 = vmul.f32 %v3736_v26, %v3953_v11  ;;  %v863_v44 = vmul.f32 %v3835_v58, %v3968_v37  ;;  %v4000_v40 = vmul.f32 %v3853_v53, %v3968_v37  ;;  %v840_v18 = vrot.slane %v826_v24, 1 }
 0x141   : > { %v657_v50 = vsel %vm415_vm1, %v3847_v48, %v652_v20  ;;  %v658_v56 = vsel %vm415_vm1, %v652_v20, %v3888_v60  ;;  %v3984_v48 = vmul.f32 %v3758_v15, %v3953_v11  ;;  %v828_v60 = vmul.f32 %v3778_v57, %v824_v27 }
 0x142   : > { %v665_v49 = vadd.f32 %v657_v50, %v590_v59  ;;  %v666_v31 = vadd.f32 %v658_v56, %v591_v14  ;;  %1707 = vrot.lane.b32.xlu1 %v1696_v43, %s2736_s22  ;;  %v837_v16 = vrot.slane %v825_v2, 1  ;;  %v879_v25 = vrot.slane %v864_v7, 2 }
 0x143   : > { %1709 = vrot.lane.b32.xlu0 %v1698_v30, %s2736_s22  ;;  %v838_v42 = vrot.slane %v3984_v48, 1  ;;  %v841_v19 = vrot.slane %v828_v60, 1  ;;  %v880_v12 = vrot.slane %v3994_v10, 2  ;;  %v877_v36 = vrot.slane %v4000_v40, 2 }
 0x144   : > { %v800_v28 = vpop.permute.xlu1 %799  ;;  %v796_v47 = vpop.permute.xlu0 %795  ;;  %v829_v48 = vmul.f32 %v3896_v63, %v3953_v11  ;;  %v868_v7 = vmul.f32 %v3896_v63, %v3964_v45 }
 0x145   : > { %v805_v4 = vsel %vm386_vm0, %v794_v6, %v796_v47  ;;  %v806_v0 = vsel %vm386_vm0, %v796_v47, %v3908_v13  ;;  %v876_v6 = vrot.slane %v863_v44, 2  ;;  %v842_v50 = vsel %vm573_vm3, %v840_v18, %v841_v19 }
 0x146   : > { %1705 = vrot.lane.b32.xlu1 %v1694_v39, %s2736_s22  ;;  %v839_v56 = vsel %vm573_vm3, %v837_v16, %v838_v42  ;;  %v884_v39 = vrot.slane %v868_v7, 2  ;;  %v867_v18 = vmul.f32 %v3821_v51, %v3968_v37 }
 0x148   : > { %v721_v62 = vpop.permute.xlu1 %720  ;;  %v727_v17 = vpop.permute.xlu0 %726  ;;  %v885_v45 = vsel %vm875_vm4, %v880_v12, %v884_v39 }
 0x149   : > { %v730_v38 = vsel %vm442_vm2, %v3845_v32, %v721_v62  ;;  %v731_v41 = vsel %vm442_vm2, %v721_v62, %v3799_v21  ;;  %v732_v13 = vsel %vm442_vm2, %v3890_v5, %v727_v17  ;;  %v733_v3 = vsel %vm442_vm2, %v727_v17, %v729_v33 }
 0x14a   : > { %v738_v59 = vadd.f32 %v730_v38, %v663_v54  ;;  %v739_v14 = vadd.f32 %v731_v41, %v664_v29  ;;  %v740_v20 = vadd.f32 %v732_v13, %v665_v49  ;;  %v741_v23 = vadd.f32 %v733_v3, %v666_v31 }
 0x14b   : > { %v830_v32 = vmul.f32 %v3883_v52, %v824_v27  ;;  %v881_v54 = vsel %vm875_vm4, %v879_v25, %v880_v12  ;;  %v878_v29 = vsel %vm875_vm4, %v876_v6, %v877_v36  ;;  %v882_v38 = vrot.slane %v867_v18, 2 }
 0x14c   : > { %v813_v22 = vadd.f32 %v805_v4, %v738_v59  ;;  %v814_v43 = vadd.f32 %v806_v0, %v739_v14  ;;  %v802_v34 = vpop.permute.xlu1 %801  ;;  %v948_v8 = vpop.permute.xlu0 %947  ;;  %v843_v0 = vrot.slane %v829_v48, 1 }
 0x14d   : > { %v807_v21 = vsel %vm386_vm0, %v800_v28, %v802_v34  ;;  %v808_v5 = vsel %vm386_vm0, %v802_v34, %v3910_v55  ;;  %v845_v47 = vrot.slane %v830_v32, 1  ;;  %v883_v37 = vsel %vm875_vm4, %v877_v36, %v882_v38 }
 0x14e   : > { %v815_v33 = vadd.f32 %v807_v21, %v740_v20  ;;  %v816_v49 = vadd.f32 %v808_v5, %v741_v23  ;;  %v852_v31 = vadd.f32 %v842_v50, %v814_v43  ;;  %v851_v30 = vadd.f32 %v839_v56, %v813_v22 }
 0x14f   : > { %v846_v11 = vsel %vm573_vm3, %v841_v19, %v845_v47  ;;  %v844_v25 = vsel %vm573_vm3, %v838_v42, %v843_v0 }
 0x150   : > { %v950_v60 = vpop.permute.xlu1 %949  ;;  %v891_v27 = vadd.f32 %v881_v54, %v852_v31  ;;  %v946_v24 = vpop.permute.xlu0 %945  ;;  %v890_v2 = vadd.f32 %v878_v29, %v851_v30  ;;  %v854_v16 = vadd.f32 %v846_v11, %v816_v49  ;;  %v853_v13 = vadd.f32 %v844_v25, %v815_v33 }
 0x151   : > { %v958_v28 = vsel %vm415_vm1, %v948_v8, %v950_v60  ;;  %v957_v55 = vsel %vm415_vm1, %v946_v24, %v948_v8 }
 0x152   : > { %v4033_v10 = vadd.f32 %v958_v28, %v891_v27  ;;  %v965_v44 = vadd.f32 %v957_v55, %v890_v2  ;;  %v893_v59 = vadd.f32 %v885_v45, %v854_v16  ;;  %v892_v50 = vadd.f32 %v883_v37, %v853_v13  ;;  %v4592_v27 = vld [vmem:[#allocation8_spill] sm:$0xff] }
 0x153   : > { %v1126_v24 = vrot.slane %v3958_v61, %v4592_v27  ;;  %v1122_v28 = vrot.slane %v3949_v46, %v4592_v27 }
 0x154   : > { %v1023_v40 = vpop.permute.xlu1 %1022  ;;  %v1025_v4 = vpop.permute.xlu0 %1024 }
 0x155   : > { %v1128_v55 = vmul.f32 %v3768_v1, %v1126_v24  ;;  %v1130_v7 = vmul.f32 %v3778_v57, %v1126_v24  ;;  %v1033_v18 = vsel %vm442_vm2, %v1023_v40, %v1025_v4  ;;  %v1127_v16 = vmul.f32 %v3736_v26, %v1122_v28 }
 0x156   : > { %v4101_v25 = vmul.f32 %v3758_v15, %v1122_v28 }
 0x157   : > { %v1143_v38 = vrot.slane %v1130_v7, 2  ;;  %v1139_v37 = vrot.slane %v1127_v16, 2  ;;  %v4131_v16 = vmul.f32 %v3896_v63, %v1122_v28 }
 0x158   : > { %v1021_v62 = vpop.permute.xlu1 %1020  ;;  %v954_v17 = vpop.permute.xlu0 %953 }
 0x159   : > { %v1032_v6 = vsel %vm442_vm2, %v1021_v62, %v1023_v40 }
 0x15a   : > { %v4041_v41 = vadd.f32 %v1032_v6, %v965_v44  ;;  %v4593_v44 = vld [vmem:[#allocation9_spill] sm:$0xff]  ;;  %v2669_v6 = vld [vmem:[%s4537_s2 + $0x28] sm:$0xff] }
 0x15b   : > { %v1164_v0 = vrot.slane %v3958_v61, %v4593_v44  ;;  %v1160_v62 = vrot.slane %v3949_v46, %v4593_v44  ;;  %v4594_v61 = vld [vmem:[#allocation7_spill] sm:$0xff]  ;;  %v1041_v46 = vadd.f32 %v1033_v18, %v4033_v10  ;;  %v4597_v44 = vrot.slane %v4101_v25, 2 }
 0x15c   : > { %v956_v3 = vpop.permute.xlu1 %955  ;;  %v1098_v19 = vpop.permute.xlu0 %1097  ;;  %v1428_v45 = vrot.slane %v2669_v6, %v4594_v61 }
 0x15d   : > { %v960_v14 = vsel %vm415_vm1, %v954_v17, %v956_v3  ;;  %v1166_v40 = vmul.f32 %v3736_v26, %v1164_v0  ;;  %v4110_v4 = vmul.f32 %v3758_v15, %v1164_v0  ;;  %v1132_v3 = vmul.f32 %v3883_v52, %v1126_v24 }
 0x15e   : > { %v4045_v20 = vadd.f32 %v960_v14, %v893_v59  ;;  %v1430_v27 = vmul.f32 %v3768_v1, %v1428_v45 }
 0x15f   : > { %v1181_v7 = vrot.slane %v1166_v40, 3  ;;  %v1147_v18 = vrot.slane %v1132_v3, 2 }
 0x160   : > { %v1100_v23 = vpop.permute.xlu1 %1099  ;;  %v952_v42 = vpop.permute.xlu0 %951  ;;  %v1444_v3 = vrot.slane %v1430_v27, 3  ;;  %v1145_v27 = vrot.slane %v4131_v16, 2 }
 0x161   : > { %v959_v56 = vsel %vm415_vm1, %v952_v42, %v954_v17  ;;  %v1142_v17 = vrot.slane %v1128_v55, 2  ;;  %v1108_v13 = vsel %vm386_vm0, %v1098_v19, %v1100_v23  ;;  %v4120_v42 = vmul.f32 %v3853_v53, %v1160_v62 }
 0x162   : > { %v4048_v22 = vadd.f32 %v959_v56, %v892_v50  ;;  %v1165_v50 = vmul.f32 %v3835_v58, %v1160_v62  ;;  %v1116_v23 = vadd.f32 %v1108_v13, %v1041_v46  ;;  %v4125_v55 = vmul.f32 %v3778_v57, %v1428_v45 }
 0x163   : > { %v1144_v10 = vsel %vm875_vm4, %v1142_v17, %v1143_v38  ;;  %v4134_v13 = vmul.f32 %v3896_v63, %v1164_v0  ;;  %v4137_v46 = vmul.f32 %v3821_v51, %v1160_v62  ;;  %v1141_v62 = vsel %vm875_vm4, %v1139_v37, %v4597_v44 }
 0x164   : > { %v1096_v12 = vpop.permute.xlu1 %1095  ;;  %v4050_v43 = vpop.permute.xlu0 %1028  ;;  %v1178_v17 = vrot.slane %v1165_v50, 3  ;;  %v1154_v40 = vadd.f32 %v1144_v10, %v1116_v23  ;;  %v4567_v0 = vrot.slane %v4125_v55, 3  ;;  %v2670_v50 = vld [vmem:[%s4537_s2 + $0x20] sm:$0xff] }
 0x165   : > { %v1107_v24 = vsel %vm386_vm0, %v1096_v12, %v1098_v19  ;;  %v1179_v19 = vrot.slane %v4120_v42, 3  ;;  %v4145_v12 = vrot.slane %v2669_v6, %v4587_v9  ;;  %v1424_v6 = vrot.slane %v2670_v50, %v4594_v61 }
 0x166   : > { %v1115_v28 = vadd.f32 %v1107_v24, %v4041_v41  ;;  %v4160_v23 = vrot.slane %v2670_v50, %v4587_v9  ;;  %v1148_v41 = vsel %vm875_vm4, %v1143_v38, %v1147_v18  ;;  %v1186_v10 = vrot.slane %v4134_v13, 3 }
 0x167   : > { %v1184_v37 = vrot.slane %v4137_v46, 3  ;;  %v1180_v9 = vsel %vm1177_vm5, %v1178_v17, %v1179_v19  ;;  %v1468_v61 = vmul.f32 %v3736_v26, %v4145_v12  ;;  %v4180_v38 = vmul.f32 %v3758_v15, %v4145_v12 }
 0x168   : > { %v4052_v32 = vpop.permute.xlu1 %1030  ;;  %v4054_v34 = vpop.permute.xlu0 %1026  ;;  %v1153_v44 = vadd.f32 %v1141_v62, %v1115_v28  ;;  %v1429_v46 = vmul.f32 %v3736_v26, %v1424_v6  ;;  %v4193_v17 = vmul.f32 %v3758_v15, %v1424_v6  ;;  %v1467_v28 = vmul.f32 %v3835_v58, %v4160_v23 }
 0x169   : > { %v1035_v18 = vsel %vm442_vm2, %v4050_v43, %v4052_v32  ;;  %v4203_v62 = vmul.f32 %v3853_v53, %v4160_v23  ;;  %v1034_v50 = vsel %vm442_vm2, %v4054_v34, %v4050_v43  ;;  %v1483_v53 = vrot.slane %v1468_v61, 4 }
 0x16c   : > { %v4056_v8 = vpop.permute.xlu1 %1103  ;;  %v4058_v21 = vpop.permute.xlu0 %1105 }
 0x16d   : > { %v1110_v32 = vsel %vm386_vm0, %v4056_v8, %v4058_v21 }
 0x170   : > { %v4060_v36 = vpop.permute.xlu1 %1101  ;;  %v4062_v5 = vpop.permute.xlu0 %1249 }
 0x171   : > { %v1109_v43 = vsel %vm386_vm0, %v4060_v36, %v4056_v8 }
 0x174   : > { %v4064_v54 = vpop.permute.xlu1 %1251  ;;  %v4066_v29 = vpop.permute.xlu0 %1247 }
 0x175   : > { %v1259_v58 = vsel %vm415_vm1, %v4066_v29, %v4062_v5  ;;  %v4227_v29 = vld [vmem:[%s4537_s2 + $0x38] ss:$0 sm:$0xff] }
 0x178   : > { %v4068_v33 = vpop.permute.xlu1 %1324  ;;  %v4070_v49 = vpop.permute.xlu0 %1326 }
 0x179   : > { %v1335_v13 = vsel %vm442_vm2, %v4068_v33, %v4070_v49  ;;  %v1043_v49 = vadd.f32 %v1035_v18, %v4045_v20 }
 0x17b   : > { %v1118_v20 = vadd.f32 %v1110_v32, %v1043_v49 }
 0x17c   : > { %v4072_v31 = vpop.permute.xlu1 %1322  ;;  %v4074_v30 = vpop.permute.xlu0 %1255 }
 0x17d   : > { %v1334_v34 = vsel %vm442_vm2, %v4072_v31, %v4068_v33  ;;  %v1481_v33 = vrot.slane %v4203_v62, 4  ;;  %v1156_v49 = vadd.f32 %v1148_v41, %v1118_v20 }
 0x180   : > { %v4076_v48 = vpop.permute.xlu1 %1257  ;;  %v4078_v60 = vpop.permute.xlu0 %1399 }
 0x184   : > { %v4082_v2 = vpop.permute.xlu1 %1401  ;;  %v4084_v47 = vpop.permute.xlu0 %1253 }
 0x185   : > { %v1410_v21 = vsel %vm386_vm0, %v4078_v60, %v4082_v2  ;;  %v1042_v2 = vadd.f32 %v1034_v50, %v4048_v22  ;;  %v4239_v22 = vmul.f32 %v3778_v57, %v4227_v29  ;;  %v4599_v50 = vrot.slane %v4101_v25, 2  ;;  %v4257_v25 = vld [vmem:[%s4537_s2 + $0x30] ss:$0 sm:$0xff] }
 0x188   : > { %v4092_v11 = vpop.permute.xlu1 %1397  ;;  %v4094_v39 = vpop.permute.xlu0 %1330 }
 0x189   : > { %v1409_v8 = vsel %vm386_vm0, %v4092_v11, %v4078_v60  ;;  %v4600_v60 = vrot.slane %v4110_v4, 3 }
 0x18b   : > { %v1187_v11 = vsel %vm1177_vm5, %v4600_v60, %v1186_v10  ;;  %v1472_v10 = vmul.f32 %v3896_v63, %v4145_v12 }
 0x18c   : > { %v4114_v59 = vpop.permute.xlu1 %1332  ;;  %v4116_v14 = vpop.permute.xlu0 %1328 }
 0x18d   : > { %4595 = vst [vmem:[#allocation11_spill] sm:$0xff] %v4116_v14  ;;  %v4598_v14 = vrot.slane %v4110_v4, 3  ;;  %v1337_v12 = vsel %vm442_vm2, %v4094_v39, %v4114_v59 }
 0x190   : > { %v4139_v56 = vpop.permute.xlu1 %1405  ;;  %v4141_v35 = vpop.permute.xlu0 %1407 }
 0x191   : > { %4596 = vst [vmem:[#allocation5_spill] sm:$0xff] %v4139_v56  ;;  %v1183_v56 = vsel %vm1177_vm5, %v1181_v7, %v4598_v14  ;;  %v1260_v7 = vsel %vm415_vm1, %v4062_v5, %v4064_v54  ;;  %v1446_v54 = vsel %vm1177_vm5, %v1444_v3, %v4567_v0  ;;  %v1484_v0 = vrot.slane %v4180_v38, 4 }
 0x192   : > { %v1193_v16 = vadd.f32 %v1183_v56, %v1154_v40  ;;  %v1434_v40 = vmul.f32 %v3883_v52, %v1428_v45  ;;  %v1441_v5 = vrot.slane %v1429_v46, 3  ;;  %v1117_v46 = vadd.f32 %v1109_v43, %v1042_v2 }
 0x193   : > { %v1485_v57 = vsel %vm1479_vm6, %v1483_v53, %v1484_v0  ;;  %v1731_v43 = vmul.f32 %v3736_v26, %v4257_v25  ;;  %v1471_v26 = vmul.f32 %v3821_v51, %v4160_v23 }
 0x194   : > { %v4166_v24 = vpop.permute.xlu1 %1403  ;;  %v4168_v14 = vpop.permute.xlu0 %1551  ;;  %v1268_v56 = vadd.f32 %v1260_v7, %v1193_v16  ;;  %v1192_v7 = vadd.f32 %v1180_v9, %v1153_v44  ;;  %v1442_v44 = vrot.slane %v4193_v17, 3  ;;  %v1449_v36 = vrot.slane %v1434_v40, 3 }
 0x195   : > { %v1743_v51 = vrot.slane %v1731_v43, 4  ;;  %v1736_v17 = vmul.f32 %v3883_v52, %v4227_v29 }
 0x196   : > { %v1343_v16 = vadd.f32 %v1335_v13, %v1268_v56  ;;  %v1267_v9 = vadd.f32 %v1259_v58, %v1192_v7  ;;  %v1480_v13 = vrot.slane %v1467_v28, 4  ;;  %v1732_v56 = vmul.f32 %v3768_v1, %v4227_v29 }
 0x197   : > { %v1146_v58 = vsel %vm875_vm4, %v4599_v50, %v1145_v27  ;;  %v1433_v28 = vmul.f32 %v3896_v63, %v1424_v6  ;;  %v1185_v1 = vsel %vm1177_vm5, %v1179_v19, %v1184_v37  ;;  %v1443_v4 = vsel %vm1177_vm5, %v1441_v5, %v1442_v44 }
 0x198   : > { %v1554_v3 = vpop.permute.xlu1 %1553  ;;  %v1418_v61 = vadd.f32 %v1410_v21, %v1343_v16  ;;  %v1342_v32 = vadd.f32 %v1334_v34, %v1267_v9  ;;  %v4601_v6 = vrot.slane %v4125_v55, 3  ;;  %v1482_v19 = vsel %vm1479_vm6, %v1480_v13, %v1481_v33  ;;  %v4602_v59 = vld [vmem:[#allocation5_spill] sm:$0xff] }
 0x199   : > { %v4215_v45 = vpop.permute.xlu0 %1549  ;;  %v1155_v37 = vadd.f32 %v1146_v58, %v1117_v46  ;;  %v1746_v7 = vrot.slane %v1732_v56, 4  ;;  %v1747_v16 = vrot.slane %v4239_v22, 4  ;;  %v1195_v55 = vadd.f32 %v1187_v11, %v1156_v49  ;;  %v4603_v56 = vld [vmem:[#allocation11_spill] sm:$0xff]  ;;  %v2592_v22 = vld [vmem:[%s4541_s6 + $0x4] ss:$8 sps:$4 sm:$0xff]  }
 0x19a   : > { %v1456_v40 = vadd.f32 %v1446_v54, %v1418_v61  ;;  %v1417_v21 = vadd.f32 %v1409_v8, %v1342_v32  ;;  %v1450_v42 = vsel %vm1177_vm5, %v4601_v6, %v1449_v36  ;;  %v1262_v54 = vsel %vm415_vm1, %v4074_v30, %v4076_v48  ;;  %2093 = vmatprep.subr.bf16.mxu1 %v2592_v22 }
 0x19b   : > { %v1447_v53 = vrot.slane %v1433_v28, 3  ;;  %v1562_v20 = vsel %vm415_vm1, %v4168_v14, %v1554_v3  ;;  %v4285_v48 = vmul.f32 %v3758_v15, %v4257_v25  ;;  %v1270_v9 = vadd.f32 %v1262_v54, %v1195_v55 }
 0x19c   : > { %v1627_v18 = vpop.permute.xlu1 %1626  ;;  %v1455_v34 = vadd.f32 %v1443_v4, %v1417_v21  ;;  %v1495_v5 = vadd.f32 %v1485_v57, %v1456_v40  ;;  %v1261_v61 = vsel %vm415_vm1, %v4084_v47, %v4074_v30  ;;  %v1194_v36 = vadd.f32 %v1185_v1, %v1155_v37 }
 0x19d   : > { %v1629_v31 = vpop.permute.xlu0 %1628  ;;  %v1412_v13 = vsel %vm386_vm0, %v4602_v59, %v4141_v35  ;;  %v1748_v15 = vsel %vm1479_vm6, %v1746_v7, %v1747_v16  ;;  %v1345_v32 = vadd.f32 %v1337_v12, %v1270_v9  ;;  %v1336_v30 = vsel %vm442_vm2, %v4603_v56, %v4094_v39  ;;  %v2594_v56 = vld [vmem:[%s4541_s6] ss:$8 sps:$4 sm:$0xff]  }
 0x19e   : > { %v1637_v3 = vsel %vm442_vm2, %v1627_v18, %v1629_v31  ;;  %v1570_v46 = vadd.f32 %v1562_v20, %v1495_v5  ;;  %v1561_v47 = vsel %vm415_vm1, %v4215_v45, %v4168_v14  ;;  %v1269_v23 = vadd.f32 %v1261_v61, %v1194_v36  ;;  %2094 = vmatpush1.bf16.msra.mxu1 %v2594_v56  ;;  %v2618_v56 = vld [vmem:[%s4541_s6 + $0x84] ss:$8 sps:$4 sm:$0xff]  }
 0x19f   : > { %v1494_v31 = vadd.f32 %v1482_v19, %v1455_v34  ;;  %v1744_v35 = vrot.slane %v4285_v48, 4  ;;  %v1420_v58 = vadd.f32 %v1412_v13, %v1345_v32  ;;  %v1411_v60 = vsel %vm386_vm0, %v4166_v24, %v4602_v59 }
 0x1a0   : > { %v1625_v41 = vpop.permute.xlu1 %1624  ;;  %v1645_v49 = vadd.f32 %v1637_v3, %v1570_v46  ;;  %v1344_v40 = vadd.f32 %v1336_v30, %v1269_v23  ;;  %v1488_v14 = vrot.slane %v1472_v10, 4  ;;  %v1448_v21 = vsel %vm1177_vm5, %v1442_v44, %v1447_v53 }
 0x1a1   : > { %v4268_v27 = vpop.permute.xlu0 %1557  ;;  %v1636_v11 = vsel %vm442_vm2, %v1625_v41, %v1627_v18  ;;  %v1569_v1 = vadd.f32 %v1561_v47, %v1494_v31  ;;  %v1458_v37 = vadd.f32 %v1450_v42, %v1420_v58  ;;  %v1486_v54 = vrot.slane %v1471_v26, 4  ;;  %v2595_v47 = vld [vmem:[%s4541_s6 + $0x14] ss:$8 sps:$4 sm:$0xff]  }
 0x1a2   : > { %v1419_v57 = vadd.f32 %v1411_v60, %v1344_v40  ;;  %v1745_v41 = vsel %vm1479_vm6, %v1743_v51, %v1744_v35  ;;  %v1489_v10 = vsel %vm1479_vm6, %v1484_v0, %v1488_v14  ;;  %v1735_v0 = vmul.f32 %v3896_v63, %v4257_v25  ;;  %2095 = vmatprep.subr.bf16.mxu1 %v2595_v47  ;;  %v2600_v60 = vld [vmem:[%s4541_s6 + $0x20] ss:$8 sps:$4 sm:$0xff]   ;;  %v2621_v47 = vld [vmem:[%s4541_s6 + $0x94] ss:$8 sps:$4 sm:$0xff]  }
 0x1a3   : > { %v1644_v4 = vadd.f32 %v1636_v11, %v1569_v1  ;;  %v1497_v20 = vadd.f32 %v1489_v10, %v1458_v37  ;;  %v1487_v43 = vsel %vm1479_vm6, %v1481_v33, %v1486_v54  ;;  %v1751_v12 = vrot.slane %v1736_v17, 4  ;;  %v2601_v11 = vld [vmem:[%s4541_s6 + $0x34] ss:$8 sps:$4 sm:$0xff]   ;;  %v2604_v1 = vld [vmem:[%s4541_s6 + $0x44] ss:$8 sps:$4 sm:$0xff]  }
 0x1a4   : > { %v1560_v2 = vpop.permute.xlu1 %1559  ;;  %v1457_v44 = vadd.f32 %v1448_v21, %v1419_v57  ;;  %v1749_v61 = vrot.slane %v1735_v0, 4  ;;  %v2610_v37 = vld [vmem:[%s4541_s6 + $0x64] ss:$8 sps:$4 sm:$0xff]   ;;  %v2738_v17 = vmov 0  }
 0x1a5   : > { %v1702_v8 = vpop.permute.xlu0 %1701  ;;  %v1564_v55 = vsel %vm415_vm1, %v4268_v27, %v1560_v2  ;;  %v1752_v63 = vsel %vm1479_vm6, %v1747_v16, %v1751_v12  ;;  %v4604_v16 = vld [vmem:[#allocation10_spill] sm:$0xff]  ;;  %2125 = vmatprep.mubr.bf16.mxu1 %v2738_v17 }
 0x1a6   : > { %v1572_v52 = vadd.f32 %v1564_v55, %v1497_v20  ;;  %v1496_v5 = vadd.f32 %v1487_v43, %v1457_v44  ;;  %v1750_v59 = vsel %vm1479_vm6, %v1744_v35, %v1749_v61  ;;  %v4605_v35 = vld [vmem:[#allocation6_spill] sm:$0xff] }
 0x1a7   : > { %v1973_v44 = vld [vmem:[%s323_s18 + $0x8] sm:$0xff] }
 0x1a8   : > { %v1704_v50 = vpop.permute.xlu1 %1703 }
 0x1a9   : > { %v1712_v39 = vsel %vm386_vm0, %v1702_v8, %v1704_v50  ;;  %v1556_v28 = vpop.permute.xlu0 %1555  ;;  %v2598_v50 = vld [vmem:[%s4541_s6 + $0x24] ss:$8 sps:$4 sm:$0xff]  }
 0x1aa   : > { %v1720_v45 = vadd.f32 %v1712_v39, %v1645_v49  ;;  %v1563_v29 = vsel %vm415_vm1, %v1556_v28, %v4268_v27  ;;  %v2597_v49 = vld [vmem:[%s4541_s6 + $0x10] ss:$8 sps:$4 sm:$0xff]  }
 0x1ab   : > { %v1571_v33 = vadd.f32 %v1563_v29, %v1496_v5  ;;  %2096 = vmatpush1.bf16.msra.mxu1 %v2597_v49  ;;  %v2603_v28 = vld [vmem:[%s4541_s6 + $0x30] ss:$8 sps:$4 sm:$0xff]   ;;  %v2627_v49 = vld [vmem:[%s4541_s6 + $0xb4] ss:$8 sps:$4 sm:$0xff]  }
 0x1ac   : > { %v1700_v6 = vpop.permute.xlu1 %1699  ;;  %v1758_v19 = vadd.f32 %v1748_v15, %v1720_v45  ;;  %v1825_v15 = vld [vmem:[%s4540_s5] sm:$0x3]  ;;  %2097 = vmatprep.subr.bf16.mxu1 %v2598_v50  ;;  %v2625_v50 = vld [vmem:[%s4541_s6 + $0xb0] ss:$8 sps:$4 sm:$0xff]  }
 0x1ad   : > { %v1711_v24 = vsel %vm386_vm0, %v1700_v6, %v1702_v8  ;;  %v1633_v18 = vpop.permute.xlu0 %1632  ;;  %v1830_v32 = vrot.slane %v1825_v15, %v4604_v16  ;;  %v1834_v58 = vrot.slane %v1825_v15, %v4605_v35  ;;  %v2607_v6 = vld [vmem:[%s4541_s6 + $0x54] ss:$8 sps:$4 sm:$0xff]  }
 0x1ae   : > { %v1719_v7 = vadd.f32 %v1711_v24, %v1644_v4  ;;  %1901 = vmatprep.mubr.f32.mxu0 %v1758_v19  ;;  %v2606_v4 = vld [vmem:[%s4541_s6 + $0x40] ss:$8 sps:$4 sm:$0xff]   ;;  %v2609_v19 = vld [vmem:[%s4541_s6 + $0x50] ss:$8 sps:$4 sm:$0xff]  }
 0x1af   : > { %2098 = vmatpush1.bf16.msra.mxu1 %v2600_v60  ;;  %v2612_v24 = vld [vmem:[%s4541_s6 + $0x60] ss:$8 sps:$4 sm:$0xff]  }
 0x1b0   : > { %v1635_v42 = vpop.permute.xlu1 %1634  ;;  %v1757_v53 = vadd.f32 %v1745_v41, %v1719_v7  ;;  %2099 = vmatprep.subr.bf16.mxu1 %v2601_v11  ;;  %v1972_v41 = vld [vmem:[%s323_s18] sm:$0xff]  ;;  %v2615_v7 = vld [vmem:[%s4541_s6 + $0x70] ss:$8 sps:$4 sm:$0xff]   ;;  %v2633_v11 = vld [vmem:[%s4541_s6 + $0xd4] ss:$8 sps:$4 sm:$0xff]   ;;  %s2739_s18 = smov [#allocation2]  }
 0x1b1   : > { %v1631_v34 = vpop.permute.xlu0 %1630  ;;  %v1639_v38 = vsel %vm442_vm2, %v1633_v18, %v1635_v42  ;;  %v2628_v60 = vld [vmem:[%s4541_s6 + $0xc0] ss:$8 sps:$4 sm:$0xff]   ;;  %s2675_s20 = sshll.u32 %s2739_s18, 4  ;;  %s2676_s20 = int_to_ptr.vmem [resolvable:$false] %s2675_s20 }
 0x1b2   : > { %1902 = vmatmul.mubr.f32.vlgmr.msra.gmra.mrb[0].mxu0 %v1757_v53  ;;  %v1647_v48 = vadd.f32 %v1639_v38, %v1572_v52  ;;  %v1638_v9 = vsel %vm442_vm2, %v1631_v34, %v1633_v18  ;;  %v2613_v18 = vld [vmem:[%s4541_s6 + $0x74] ss:$8 sps:$4 sm:$0xff]   ;;  %s2677_s19 = scalar_lea.vmem %s2676_s20, 512 }
 0x1b3   : > { %v1646_v8 = vadd.f32 %v1638_v9, %v1571_v33  ;;  %2100 = vmatpush1.bf16.msra.mxu1 %v2603_v28  ;;  %v2636_v28 = vld [vmem:[%s4541_s6 + $0xe4] ss:$8 sps:$4 sm:$0xff]  }
 0x1b4   : > { %v1708_v2 = vpop.permute.xlu1 %1707  ;;  %2101 = vmatprep.subr.bf16.mxu1 %v2604_v1  ;;  %v2639_v1 = vld [vmem:[%s4541_s6 + $0xf4] ss:$8 sps:$4 sm:$0xff]  }
 0x1b5   : > { %v1710_v62 = vpop.permute.xlu0 %1709 }
 0x1b6   : > { %v1714_v3 = vsel %vm386_vm0, %v1708_v2, %v1710_v62 }
 0x1b7   : > { %v1722_v25 = vadd.f32 %v1714_v3, %v1647_v48  ;;  %2102 = vmatpush1.bf16.msra.mxu1 %v2606_v4 }
 0x1b8   : > { %v1706_v26 = vpop.permute.xlu1 %1705  ;;  %2103 = vmatprep.subr.bf16.mxu1 %v2607_v6 }
 0x1b9   : > { %v1713_v36 = vsel %vm386_vm0, %v1706_v26, %v1708_v2  ;;  %v1760_v27 = vadd.f32 %v1752_v63, %v1722_v25 }
 0x1ba   : > { %v1721_v13 = vadd.f32 %v1713_v36, %v1646_v8 }
 0x1bb   : > { %1907 = vmatprep.mubr.f32.mxu0 %v1760_v27  ;;  %2104 = vmatpush1.bf16.msra.mxu1 %v2609_v19 }
 0x1bc   : > { %v1759_v46 = vadd.f32 %v1750_v59, %v1721_v13  ;;  %2105 = vmatprep.subr.bf16.mxu1 %v2610_v37 }
 0x1be   : > { %1908 = vmatmul.mubr.f32.gmra.mrb[2].mxu0 %v1759_v46 }
 0x1bf   : > { %2106 = vmatpush1.bf16.msra.mxu1 %v2612_v24 }
 0x1c0   : > { %2107 = vmatprep.subr.bf16.mxu1 %v2613_v18 }
 0x1c3   : > { %2108 = vmatpush1.bf16.msra.mxu1 %v2615_v7 }
 0x1c4   : > { %2265 = vmatprep.subr.bf16.mxu1 %v2618_v56 }
 0x285   : > { %v1903_v30 = vpop.f32.mrb[0].mxu0 }
 0x286   : > { %v1904_v51 = vadd.f32 %v1903_v30, %v1830_v32  ;;  %v1905_v23 = vpop.f32.mrb[1].mxu0  ;;  %v2616_v30 = vld [vmem:[%s4541_s6 + $0x80] ss:$8 sps:$4 sm:$0xff]  }
 0x287   : > { %v1906_v39 = vadd.f32 %v1905_v23, %v1834_v58  ;;  %v2624_v23 = vld [vmem:[%s4541_s6 + $0xa4] ss:$8 sps:$4 sm:$0xff]  }
 0x288   : > { %v4351_v31 = vmax.f32 %v1904_v51, 0.0  ;;  %v2619_v51 = vld [vmem:[%s4541_s6 + $0x90] ss:$8 sps:$4 sm:$0xff]  }
 0x289   : > { %v1915_v21 = vmax.f32 %v1906_v39, 0.0  ;;  %v2631_v39 = vld [vmem:[%s4541_s6 + $0xd0] ss:$8 sps:$4 sm:$0xff]  }
 0x28a   : > { %1920 = vrot.lane.b32.xlu0 %v4351_v31, %s4568_s23 }
 0x28e   : > { %1928 = vrot.lane.b32.xlu0 %v4351_v31, %s2735_s21 }
 0x291   : > { %v1909_v40 = vpop.f32.mrb[2].mxu0 }
 0x292   : > { %v1910_v14 = vadd.f32 %v1909_v40, %v1830_v32  ;;  %v1911_v45 = vpop.f32.mrb[3].mxu0  ;;  %1936 = vrot.lane.b32.xlu0 %v4351_v31, %s2736_s22  ;;  %v2634_v40 = vld [vmem:[%s4541_s6 + $0xe0] ss:$8 sps:$4 sm:$0xff]  }
 0x293   : > { %v1912_v54 = vadd.f32 %v1911_v45, %v1834_v58  ;;  %v2630_v58 = vld [vmem:[%s4541_s6 + $0xc4] ss:$8 sps:$4 sm:$0xff]   ;;  %v2001_v45 = vld [vmem:[%s4542_s7] sm:$0x3] }
 0x294   : > { %v1916_v57 = vmax.f32 %v1910_v14, 0.0  ;;  %v2637_v14 = vld [vmem:[%s4541_s6 + $0xf0] ss:$8 sps:$4 sm:$0xff]  }
 0x295   : > { %v1917_v10 = vmax.f32 %v1912_v54, 0.0 }
 0x296   : > { %1922 = vrot.lane.b32.xlu1 %v1916_v57, %s4568_s23  ;;  %1948 = vrot.lane.b32.xlu0 %v1915_v21, %s4568_s23 }
 0x29a   : > { %1930 = vrot.lane.b32.xlu1 %v1916_v57, %s2735_s21  ;;  %1956 = vrot.lane.b32.xlu0 %v1915_v21, %s2735_s21 }
 0x29e   : > { %1938 = vrot.lane.b32.xlu1 %v1916_v57, %s2736_s22  ;;  %1964 = vrot.lane.b32.xlu0 %v1915_v21, %s2736_s22 }
 0x2a2   : > { %1950 = vrot.lane.b32.xlu1 %v1917_v10, %s4606_s25  ;;  %1976 = vrot.lane.b32.xlu0 %v1972_v41, %s2736_s22  ;;  %s2481_s25 = sshll.u32 %s2808_s9, 8 }
 0x2a3   : > { %s4490_s13 = scalar_lea.hbm %s4543_s8, %s2481_s25 }
 0x2a6   : > { %1958 = vrot.lane.b32.xlu1 %v1917_v10, %s2735_s21  ;;  %s313_s21 = scalar_lea.vmem [#allocation2], %s2420_s10 }
 0x2aa   : > { %1966 = vrot.lane.b32.xlu1 %v1917_v10, %s2736_s22 }
 0x2ae   : > { %1978 = vrot.lane.b32.xlu1 %v1973_v44, %s2736_s22  ;;  %s2342_s22 = sshll.u32 %s313_s21, 4  ;;  %s4492_s22 = int_to_ptr.vmem [resolvable:$true] %s2342_s22 }
 0x2af   : > { %s2671_s9 = scalar_lea.vmem %s4492_s22, 256  ;;  %p2678_p0 = scmp.lt.s32.totalorder %s4492_s22, %s2676_s20 }
 0x2b0   : > { %p2672_p11 = scmp.ne.s32.totalorder %s4492_s22, %s2671_s9  ;;  %p2679_p1 = scmp.lt.s32.totalorder %s2677_s19, %s2671_s9 }
 0x2b2   : > { %p2673_p12 = pnand %p2672_p11, %p2825_p5  ;;  %p2680_p2 = por %p2679_p1, %p2678_p0 }
 0x2b4   : > { %p2674_p13 = pneg %p2673_p12 }
 0x2b6   : > { %p2681_p3 = pnand %p2680_p2, %p2674_p13 }
 0x2fc   : > { %v1921_v55 = vpop.permute.xlu0 %1920 }
 0x2fd   : > { %v1926_v0 = vmax.f32 %v4351_v31, %v1921_v55  ;;  %v2622_v31 = vld [vmem:[%s4541_s6 + $0xa0] ss:$8 sps:$4 sm:$0xff]  }
 0x300   : > { %v1929_v42 = vpop.permute.xlu0 %1928 }
 0x301   : > { %v1934_v52 = vmax.f32 %v1926_v0, %v1929_v42 }
 0x304   : > { %v1937_v53 = vpop.permute.xlu0 %1936 }
 0x305   : > { %v1942_v2 = vmax.f32 %v1934_v52, %v1937_v53 }
 0x307   : > { %v1944_v62 = vmax.f32 %v1942_v2, %v1915_v21  ;;  %v2006_v21 = vrot.slane %v2001_v45, %v4604_v16 }
 0x308   : > { %v1923_v20 = vpop.permute.xlu1 %1922  ;;  %v1949_v43 = vpop.permute.xlu0 %1948 }
 0x309   : > { %v1927_v38 = vmax.f32 %v1916_v57, %v1923_v20  ;;  %v1954_v63 = vmax.f32 %v1944_v62, %v1949_v43  ;;  %v2458_v62 = vld [vmem:[%s4542_s7 + $0x2] sm:$0x3] }
 0x30c   : > { %v1931_v34 = vpop.permute.xlu1 %1930  ;;  %v1957_v5 = vpop.permute.xlu0 %1956 }
 0x30d   : > { %v1935_v29 = vmax.f32 %v1927_v38, %v1931_v34  ;;  %v1962_v26 = vmax.f32 %v1954_v63, %v1957_v5 }
 0x310   : > { %v1939_v12 = vpop.permute.xlu1 %1938  ;;  %v1965_v33 = vpop.permute.xlu0 %1964 }
 0x311   : > { %v1943_v48 = vmax.f32 %v1935_v29, %v1939_v12  ;;  %v1970_v59 = vmax.f32 %v1962_v26, %v1965_v33 }
 0x313   : > { %v1945_v61 = vmax.f32 %v1943_v48, %v1917_v10 }
 0x314   : > { %v1951_v9 = vpop.permute.xlu1 %1950  ;;  %v1977_v27 = vpop.permute.xlu0 %1976 }
 0x315   : > { %v1955_v25 = vmax.f32 %v1945_v61, %v1951_v9  ;;  %v4416_v15 = vsel %vm386_vm0, %v1970_v59, %v1977_v27  ;;  %v2178_v61 = vrot.slane %v2458_v62, %v4604_v16 }
 0x318   : > { %v1959_v3 = vpop.permute.xlu1 %1958 }
 0x319   : > { %v1963_v36 = vmax.f32 %v1955_v25, %v1959_v3 }
 0x31c   : > { %v1967_v8 = vpop.permute.xlu1 %1966 }
 0x31d   : > { %v1971_v13 = vmax.f32 %v1963_v36, %v1967_v8 }
 0x320   : > { %v1979_v46 = vpop.permute.xlu1 %1978 }
 0x321   : > { %v4419_v22 = vsel %vm386_vm0, %v1971_v13, %v1979_v46 }
 0x322   : > { %v1984_v32 = vpack.c.bf16 %v4419_v22, %v4416_v15 }
 0x324   : > { %2126 = vmatmul.mubr.bf16.vlgmr.msra.gmra.mrb[0].mxu1 %v1984_v32 }
 0x325   : > { %2297 = vmatprep.mubr.bf16.mxu1 %v2738_v17  ;;  %2266 = vmatpush1.bf16.msra.mxu1 %v2616_v30  ;;  %v2010_v17 = vrot.slane %v2001_v45, %v4605_v35 }
 0x326   : > { %2267 = vmatprep.subr.bf16.mxu1 %v2621_v47 }
 0x329   : > { %2268 = vmatpush1.bf16.msra.mxu1 %v2619_v51 }
 0x32a   : > { %2269 = vmatprep.subr.bf16.mxu1 %v2624_v23 }
 0x32d   : > { %2270 = vmatpush1.bf16.msra.mxu1 %v2622_v31 }
 0x32e   : > { %2271 = vmatprep.subr.bf16.mxu1 %v2627_v49 }
 0x331   : > { %2272 = vmatpush1.bf16.msra.mxu1 %v2625_v50 }
 0x332   : > { %2273 = vmatprep.subr.bf16.mxu1 %v2630_v58 }
 0x335   : > { %2274 = vmatpush1.bf16.msra.mxu1 %v2628_v60 }
 0x336   : > { %2275 = vmatprep.subr.bf16.mxu1 %v2633_v11 }
 0x339   : > { %2276 = vmatpush1.bf16.msra.mxu1 %v2631_v39 }
 0x33a   : > { %2277 = vmatprep.subr.bf16.mxu1 %v2636_v28 }
 0x33d   : > { %2278 = vmatpush1.bf16.msra.mxu1 %v2634_v40 }
 0x33e   : > { %2279 = vmatprep.subr.bf16.mxu1 %v2639_v1 }
 0x341   : > { %2280 = vmatpush1.bf16.msra.mxu1 %v2637_v14 }
 0x3f7   : > { %v2127_v57 = vpop.f32.mrb[0].mxu1 }
 0x3f8   : > { %v2128_v4 = vadd.f32 %v2127_v57, %v2006_v21  ;;  %v2129_v6 = vpop.f32.mrb[1].mxu1 }
 0x3f9   : > { %v2131_v19 = vpop.f32.mrb[2].mxu1  ;;  %v2130_v53 = vadd.f32 %v2129_v6, %v2010_v17 }
 0x3fa   : > { %v2136_v37 = vsub.f32 0.0, %v2128_v4  ;;  %v2132_v54 = vadd.f32 %v2131_v19, %v2006_v21  ;;  %v2133_v24 = vpop.f32.mrb[3].mxu1 }
 0x3fb   : > { %v2134_v20 = vadd.f32 %v2133_v24, %v2010_v17  ;;  %v2146_v43 = vmax.f32 %v2130_v53, 0.0 }
 0x3fc   : > { %v2138_v18 = vmul.f32 1.442695, %v2136_v37  ;;  %v2137_v41 = vsub.f32 0.0, %v2132_v54 }
 0x3fd   : > { %v2147_v34 = vmax.f32 %v2134_v20, 0.0  ;;  %v2148_v0 = vsub.f32 %v2146_v43, %v4416_v15 }
 0x3fe   : > { %2640 = vpow2.f32 %v2138_v18  ;;  %v2140_v10 = vmul.f32 1.442695, %v2137_v41 }
 0x3ff   : > { %v2149_v52 = vsub.f32 %v2147_v34, %v4419_v22 }
 0x400   : > { %2642 = vpow2.f32 %v2140_v10 }
 0x408   : > { %v2641_v7 = vpop.eup %2640 }
 0x409   : > { %v2142_v44 = vadd.f32 1.0, %v2641_v7 }
 0x40a   : > { %v2643_v55 = vpop.eup %2642 }
 0x40b   : > { %2644 = vrcp.f32 %v2142_v44  ;;  %v2143_v42 = vadd.f32 1.0, %v2643_v55 }
 0x40d   : > { %2646 = vrcp.f32 %v2143_v42 }
 0x415   : > { %v2645_v38 = vpop.eup %2644 }
 0x416   : > { %v2150_v12 = vmul.f32 %v2645_v38, %v2148_v0 }
 0x417   : > { %v2647_v29 = vpop.eup %2646 }
 0x418   : > { %v2151_v5 = vmul.f32 %v2647_v29, %v2149_v52  ;;  %v2152_v2 = vadd.f32 %v2150_v12, %v4416_v15  ;;  %v2182_v15 = vrot.slane %v2458_v62, %v4605_v35 }
 0x41a   : > { %v2153_v48 = vadd.f32 %v2151_v5, %v4419_v22 }
 0x41c   : > { %v2154_v9 = vpack.c.bf16 %v2153_v48, %v2152_v2 }
 0x41e   : > { %2298 = vmatmul.mubr.bf16.vlgmr.msra.gmra.mrb[4].mxu1 %v2154_v9 }
 0x4f1   : > { %v2299_v33 = vpop.f32.mrb[4].mxu1 }
 0x4f2   : > { %v2300_v3 = vadd.f32 %v2299_v33, %v2178_v61  ;;  %v2301_v63 = vpop.f32.mrb[5].mxu1 }
 0x4f3   : > { %v2303_v25 = vpop.f32.mrb[6].mxu1  ;;  %v2302_v56 = vadd.f32 %v2301_v63, %v2182_v15 }
 0x4f4   : > { %v2308_v8 = vsub.f32 0.0, %v2300_v3  ;;  %v2304_v26 = vadd.f32 %v2303_v25, %v2178_v61  ;;  %v2305_v36 = vpop.f32.mrb[7].mxu1 }
 0x4f5   : > { %v2306_v30 = vadd.f32 %v2305_v36, %v2182_v15  ;;  %v2318_v47 = vmax.f32 %v2302_v56, 0.0 }
 0x4f6   : > { %v2310_v27 = vmul.f32 1.442695, %v2308_v8  ;;  %v2309_v59 = vsub.f32 0.0, %v2304_v26 }
 0x4f7   : > { %v2319_v51 = vmax.f32 %v2306_v30, 0.0  ;;  %v2320_v23 = vsub.f32 %v2318_v47, %v2152_v2 }
 0x4f8   : > { %2648 = vpow2.f32 %v2310_v27  ;;  %v2312_v13 = vmul.f32 1.442695, %v2309_v59 }
 0x4f9   : > { %v2321_v50 = vsub.f32 %v2319_v51, %v2153_v48 }
 0x4fa   : > { %2650 = vpow2.f32 %v2312_v13 }
 0x502   : > { %v2649_v46 = vpop.eup %2648 }
 0x503   : > { %v2314_v22 = vadd.f32 1.0, %v2649_v46 }
 0x504   : > { %v2651_v32 = vpop.eup %2650 }
 0x505   : > { %2652 = vrcp.f32 %v2314_v22  ;;  %v2315_v16 = vadd.f32 1.0, %v2651_v32 }
 0x507   : > { %2654 = vrcp.f32 %v2315_v16 }
 0x50f   : > { %v2653_v31 = vpop.eup %2652 }
 0x510   : > { %v2322_v49 = vmul.f32 %v2653_v31, %v2320_v23 }
 0x511   : > { %v2655_v35 = vpop.eup %2654 }
 0x512   : > { %v2324_v58 = vadd.f32 %v2322_v49, %v2152_v2  ;;  %v2323_v60 = vmul.f32 %v2655_v35, %v2321_v50 }
 0x514   : > { %2326 = vst [vmem:[%s313_s21] sm:$0xff] %v2324_v58  ;;  %v2325_v11 = vadd.f32 %v2323_v60, %v2153_v48 }
 0x516   : > { %2327 = vst [vmem:[%s313_s21 + $0x8] sm:$0xff] %v2325_v11 }
 0x517   : > { %2684 = shalt.err (!%p2681_p3)
}
 0x518   : > { %s2685_s26 = scalar_lea.hbm %s4490_s13, 256  ;;  %s2689_s25 = scalar_lea.hbm %s4543_s8, 512 }
 0x519   : > { %p2686_p4 = scmp.ne.s32.totalorder %s4490_s13, %s2685_s26  ;;  %p2690_p9 = scmp.lt.u32.totalorder %s4490_s13, %s4543_s8 }
 0x51a   : > { %p2691_p10 = scmp.lt.u32.totalorder %s2689_s25, %s2685_s26  ;;  %p2693_p12 = scmp.lt.u32.totalorder %s2685_s26, %s4490_s13 }
 0x51b   : > { %p2687_p7 = pnand %p2686_p4, %p2825_p5 }
 0x51c   : > { %p2692_p11 = por %p2691_p10, %p2690_p9 }
 0x51d   : > { %p2688_p8 = pneg %p2687_p7 }
 0x51e   : > { %p2694_p13 = por %p2693_p12, %p2692_p11 }
 0x520   : > { %p2695_p0 = pnand %p2694_p13, %p2688_p8 }
 0x522   : > { %2698 = shalt.err (!%p2695_p0)
}
 0x523   : > { %s2740_s12 = smov 128   ;;  %s2741_s9 = smov 8  }
 0x524   : > { %2547 = dma.vmem_to_hbm [thread:$0]  (%p2825_p5), %s4492_s22, 256, %s4490_s13, %s4494_s17, %s2740_s12, %s2740_s12, %s2741_s9  }
 0x525 PF: > { %p2553_p1 = scmp.ge.s32.totalorder %s2733_s30, 2  ;;  %s2357_s18 = sand.u32 1, %s2721_s27  }
 0x526   : > { %s2358_s20 = scalar_lea.sflag [#allocation3], %s2357_s18 }
 0x527   : > { %p2550_p2 = pnand %p2553_p1, %p2829_p6 }
 0x529   : > { %2716 = dma.done.wait (!%p2550_p2), %s2358_s20, 256  }
 0x52a   : > { %2718 = vsyncadd (!%p2550_p2), %s2358_s20, 4294967040  ;;  %p18_p3 = scmp.ge.s32.totalorder %s2812_s11, 4   ;;  %s4607_s27 = smov %s2725_s28 }
 0x52b   : > { %s4608_s28 = smov %s2729_s29  ;;  %s4609_s29 = smov %s2823_s14 }
 0x52c   : > { %s4610_s30 = smov %s2812_s11  ;;  %20 = sbr.rel (!%p18_p3) target bundleno = 3 (0x3), region = 92 }
 0x533   :  { %2363 = vsyncpa [#allocation3], 1 }
 0x534   :  { %2365 = vsyncpa [#allocation3 + $0x1], 1 }

</bundles_post_ra>
